<compile_context>
chip_gen: v5e
topology: v5e:2x2
jax: 0.10.0
libtpu: 0.0.40
codegen_flags: <defaults>
</compile_context>

<pallas_src>
import functools

import jax
import jax.numpy as jnp
from jax import lax
from jax.experimental import pallas as pl
from jax.experimental.pallas import tpu as pltpu

EPS = 1e-5
_LANE = 128
_VMEM_TILE_BUDGET = 24 * 1024 * 1024   # conv working-set budget (fits v7x 64 MiB)
_VMEM_LIMIT_BYTES = 32 * 1024 * 1024


def _round_up(x, m):
    return (x + m - 1) // m * m


def _pick_tile_h(H, W, cinp, coutp, budget=_VMEM_TILE_BUDGET):
    """Largest divisor of H whose conv working set fits the VMEM budget."""
    best = 1
    for th in range(1, H + 1):
        if H % th:
            continue
        est = 4 * (
            2 * th * (W + 2) * cinp        # main input window (double buffered)
            + 4 * (W + 2) * cinp           # halo rows (double buffered)
            + 2 * 9 * cinp * coutp         # packed weights
            + 2 * th * W * coutp           # output tile (double buffered)
            + (th + 2) * (W + 2) * cinp    # in-kernel window temp
            + th * W * cinp                # per-tap patch temp
            + 2 * th * W * coutp           # f32 accumulator + store temp
        )
        if est <= budget:
            best = th
    return best


# --------------------------------------------------------------------------
# Kernel 1: 3x3 conv (input pre-padded spatially) + bias, plus one-pass
#           per-tile BatchNorm partials (sum, sum_sq).
# --------------------------------------------------------------------------
def _conv3x3_stats_kernel(x_main_ref, x_h0_ref, x_h1_ref, w_ref, b_ref,
                          y_ref, stats_ref):
    # x_main_ref : (1, tile_h, W+2, Cin_p)  padded-input rows [r0, r0+tile_h)
    # x_h0/h1    : (1, 1,      W+2, Cin_p)  padded-input rows r0+tile_h, +tile_h+1
    # w_ref      : (9, Cin_p, Cout_p)       tap-major packed weights (dy*3+dx)
    # b_ref      : (1, Cout_p)
    # y_ref      : (1, tile_h, W, Cout_p)   pre-BN conv output tile
    # stats_ref  : (1, 1, 2, Cout_p)        per-tile [sum, sum_sq]
    tile_h = y_ref.shape[1]
    W = y_ref.shape[2]
    cinp = x_main_ref.shape[3]
    coutp = y_ref.shape[3]

    # (tile_h+2, W+2, Cin_p) window; cast once if matmuls run in bf16.
    xt = jnp.concatenate(
        [x_main_ref[0], x_h0_ref[0], x_h1_ref[0]], axis=0).astype(w_ref.dtype)

    acc = jnp.zeros((tile_h * W, coutp), jnp.float32)
    for dy in range(3):
        for dx in range(3):
            patch = xt[dy:dy + tile_h, dx:dx + W, :].reshape(tile_h * W, cinp)
            acc = acc + jnp.dot(patch, w_ref[3 * dy + dx],
                                preferred_element_type=jnp.float32)

    y = acc + b_ref[...].astype(jnp.float32)            # (tile_h*W, Cout_p)
    y_ref[...] = y.reshape(1, tile_h, W, coutp)

    s = jnp.sum(y, axis=0, keepdims=True)                # (1, Cout_p)
    ss = jnp.sum(y * y, axis=0, keepdims=True)
    stats_ref[...] = jnp.concatenate([s, ss], axis=0).reshape(1, 1, 2, coutp)


# --------------------------------------------------------------------------
# Kernel 2: element-wise BatchNorm (precomputed scale/shift) + ReLU.
# --------------------------------------------------------------------------
def _bn_relu_kernel(y_ref, scale_ref, shift_ref, o_ref):
    coutp = y_ref.shape[3]
    scale = scale_ref[...].reshape(1, 1, 1, coutp)
    shift = shift_ref[...].reshape(1, 1, 1, coutp)
    o_ref[...] = jnp.maximum(y_ref[...] * scale + shift, 0.0).astype(o_ref.dtype)


def _compiler_params():
    return pltpu.CompilerParams(
        dimension_semantics=("parallel", "parallel"),
        vmem_limit_bytes=_VMEM_LIMIT_BYTES)


def _conv3x3_pass(xp, w9, b, tile_h):
    """xp: (N, H+2, W+2, Cin_p) f32; w9: (9, Cin_p, Cout_p); b: (1, Cout_p)."""
    N, hp2, wp2, cinp = xp.shape
    H, W = hp2 - 2, wp2 - 2
    coutp = w9.shape[-1]
    n_th = H // tile_h
    th = tile_h

    in_specs = [
        pl.BlockSpec((1, th, wp2, cinp), lambda n, i: (n, i, 0, 0)),
        pl.BlockSpec((1, 1, wp2, cinp), lambda n, i: (n, (i + 1) * th, 0, 0)),
        pl.BlockSpec((1, 1, wp2, cinp), lambda n, i: (n, (i + 1) * th + 1, 0, 0)),
        pl.BlockSpec((9, cinp, coutp), lambda n, i: (0, 0, 0)),
        pl.BlockSpec((1, coutp), lambda n, i: (0, 0)),
    ]
    out_specs = (
        pl.BlockSpec((1, th, W, coutp), lambda n, i: (n, i, 0, 0)),
        pl.BlockSpec((1, 1, 2, coutp), lambda n, i: (n, i, 0, 0)),
    )
    out_shape = (
        jax.ShapeDtypeStruct((N, H, W, coutp), jnp.float32),
        jax.ShapeDtypeStruct((N, n_th, 2, coutp), jnp.float32),
    )
    return pl.pallas_call(
        _conv3x3_stats_kernel,
        out_shape=out_shape,
        grid=(N, n_th),
        in_specs=in_specs,
        out_specs=out_specs,
        compiler_params=_compiler_params(),
    )(xp, xp, xp, w9, b)


def _bn_relu_pass(y, scale, shift, tile_h):
    N, H, W, coutp = y.shape
    n_th = H // tile_h
    spec_t = pl.BlockSpec((1, tile_h, W, coutp), lambda n, i: (n, i, 0, 0))
    spec_c = pl.BlockSpec((1, coutp), lambda n, i: (0, 0))
    return pl.pallas_call(
        _bn_relu_kernel,
        out_shape=jax.ShapeDtypeStruct((N, H, W, coutp), jnp.float32),
        grid=(N, n_th),
        in_specs=[spec_t, spec_c, spec_c],
        out_specs=spec_t,
        compiler_params=_compiler_params(),
    )(y, scale, shift)


def _bn_scale_shift(stats, gamma, beta, count):
    """Fold per-tile (sum, sum_sq) partials into per-channel scale/shift."""
    tot = jnp.sum(stats, axis=(0, 1))                        # (2, Cout_p)
    mean = tot[0] / count
    var = jnp.maximum(tot[1] / count - mean * mean, 0.0)     # biased variance
    scale = gamma.reshape(-1) * lax.rsqrt(var + EPS)
    shift = beta.reshape(-1) - mean * scale
    return scale.reshape(1, -1), shift.reshape(1, -1)


def double_conv(x_nchw, params, tile_h=None, matmul_dtype=jnp.float32):
    """Forward of DoubleConv. x_nchw: (N, Cin, H, W) f32. Returns (N, Cout, H, W)."""
    N, Cin, H, W = x_nchw.shape
    Cout = params["w1"].shape[-1]
    cinp = _round_up(Cin, _LANE)
    coutp = _round_up(Cout, _LANE)

    if tile_h is None:
        tile_h = _pick_tile_h(H, W, cinp, coutp)
    if H % tile_h != 0:
        raise ValueError(f"tile_h={tile_h} must divide H={H}")

    # ---- layout glue (XLA): NCHW -> NHWC, channel pad to lane width --------
    x = jnp.transpose(x_nchw, (0, 2, 3, 1)).astype(jnp.float32)
    x = jnp.pad(x, ((0, 0), (0, 0), (0, 0), (0, cinp - Cin)))

    def pad_w(w, ci, cip):                     # (9, ci, Cout) -> (9, cip, Cout_p)
        return jnp.pad(w, ((0, 0), (0, cip - ci), (0, coutp - Cout))).astype(matmul_dtype)

    def pad_c(v):                              # (1, Cout) -> (1, Cout_p)
        return jnp.pad(v, ((0, 0), (0, coutp - Cout)))

    w1 = pad_w(params["w1"], Cin, cinp)
    w2 = pad_w(params["w2"], Cout, coutp)
    b1, b2 = pad_c(params["b1"]), pad_c(params["b2"])
    g1, g2 = pad_c(params["g1"]), pad_c(params["g2"])
    be1, be2 = pad_c(params["be1"]), pad_c(params["be2"])

    count = N * H * W

    # ---- stage 1: conv -> tiled batch stats -> BN + ReLU -------------------
    xp = jnp.pad(x, ((0, 0), (1, 1), (1, 1), (0, 0)))
    y1, st1 = _conv3x3_pass(xp, w1, b1, tile_h)
    s1, t1 = _bn_scale_shift(st1, g1, be1, count)
    a1 = _bn_relu_pass(y1, s1, t1, tile_h)

    # ---- stage 2 ------------------------------------------------------------
    a1p = jnp.pad(a1, ((0, 0), (1, 1), (1, 1), (0, 0)))
    y2, st2 = _conv3x3_pass(a1p, w2, b2, tile_h)
    s2, t2 = _bn_scale_shift(st2, g2, be2, count)
    out = _bn_relu_pass(y2, s2, t2, tile_h)

    # ---- layout glue: strip channel pad, NHWC -> NCHW ----------------------
    return jnp.transpose(out[..., :Cout], (0, 3, 1, 2))


# --------------------------------------------------------------------------
# Pure-JAX reference (identical math) and parameter init.
# --------------------------------------------------------------------------
def ref_double_conv(x_nchw, params):
    x = jnp.transpose(x_nchw, (0, 2, 3, 1))

    def block(x, w9, b, g, be):
        cin, cout = x.shape[-1], w9.shape[-1]
        w = w9.reshape(3, 3, cin, cout)  # HWIO
        y = lax.conv_general_dilated(
            x, w, window_strides=(1, 1), padding="SAME",
            dimension_numbers=("NHWC", "HWIO", "NHWC"),
            precision=lax.Precision.HIGHEST)
        y = y + b.reshape(1, 1, 1, cout)
        mean = jnp.mean(y, axis=(0, 1, 2), keepdims=True)
        var = jnp.mean((y - mean) ** 2, axis=(0, 1, 2), keepdims=True)
        y = (y - mean) * lax.rsqrt(var + EPS)
        y = y * g.reshape(1, 1, 1, cout) + be.reshape(1, 1, 1, cout)
        return jnp.maximum(y, 0.0)

    y = block(x, params["w1"], params["b1"], params["g1"], params["be1"])
    y = block(y, params["w2"], params["b2"], params["g2"], params["be2"])
    return jnp.transpose(y, (0, 3, 1, 2))


def init_params(key, in_channels, out_channels):
    k1, k2, k3, k4 = jax.random.split(key, 4)
    # Conv weights stored as (9, Cin, Cout) = 3x3 taps flattened (dy*3+dx)
    w1 = 0.1 * jax.random.normal(k1, (9, in_channels, out_channels), jnp.float32)
    b1 = 0.05 * jax.random.normal(k2, (1, out_channels), jnp.float32)
    w2 = 0.1 * jax.random.normal(k3, (9, out_channels, out_channels), jnp.float32)
    b2 = 0.05 * jax.random.normal(k4, (1, out_channels), jnp.float32)
    g1 = jnp.ones((1, out_channels), jnp.float32)
    be1 = jnp.zeros((1, out_channels), jnp.float32)
    g2 = jnp.ones((1, out_channels), jnp.float32)
    be2 = jnp.zeros((1, out_channels), jnp.float32)
    return dict(w1=w1, b1=b1, g1=g1, be1=be1, w2=w2, b2=b2, g2=g2, be2=be2)


if __name__ == "__main__":
    key = jax.random.PRNGKey(0)
    kx, kp = jax.random.split(key)

    N, Cin, H, W = 2, 4, 16, 16
    Cout = 8
    x = jax.random.normal(kx, (N, Cin, H, W), jnp.float32)
    params = init_params(kp, Cin, Cout)

    ref = jax.block_until_ready(ref_double_conv(x, params))

    # Config A: forced 2 row-tiles per image -> exercises the halo BlockSpecs.
    fn_a = jax.jit(functools.partial(double_conv, tile_h=8))
    out_a = jax.block_until_ready(fn_a(x, params))
    assert out_a.shape == (N, Cout, H, W)
    assert jnp.allclose(out_a, ref, rtol=1e-4, atol=1e-4), (
        f"tile_h=8 max abs err {float(jnp.max(jnp.abs(out_a - ref)))}")

    # Config B: auto-picked tile size (single row tile at this small H).
    fn_b = jax.jit(double_conv)
    out_b = jax.block_until_ready(fn_b(x, params))
    assert out_b.shape == (N, Cout, H, W)
    assert jnp.allclose(out_b, ref, rtol=1e-4, atol=1e-4), (
        f"auto tile max abs err {float(jnp.max(jnp.abs(out_b - ref)))}")

    print("KERNEL_OK")
</pallas_src>

<mosaic_0001>
module attributes {stable_mosaic.version = 11 : i64} {
  func.func @_bn_relu_kernel(%arg0: i32, %arg1: i32, %arg2: memref<1x8x16x128xf32, #tpu.memory_space<vmem>>, %arg3: memref<1x128xf32, #tpu.memory_space<vmem>>, %arg4: memref<1x128xf32, #tpu.memory_space<vmem>>, %arg5: memref<1x8x16x128xf32, #tpu.memory_space<vmem>>) attributes {dimension_semantics = [#tpu.dimension_semantics<parallel>, #tpu.dimension_semantics<parallel>], iteration_bounds = array<i64: 2, 2>, scalar_prefetch = 0 : i64, scratch_operands = 0 : i64, tpu.core_type = #tpu.core_type<tc>, window_params = [{transform_indices = @transform_0, window_bounds = array<i64: 1, 8, 16, 128>}, {pipeline_mode = #tpu.pipeline_mode<synchronous>, transform_indices = @transform_1, window_bounds = array<i64: 1, 128>}, {pipeline_mode = #tpu.pipeline_mode<synchronous>, transform_indices = @transform_2, window_bounds = array<i64: 1, 128>}, {transform_indices = @transform_3, window_bounds = array<i64: 1, 8, 16, 128>}]} {
    %c0 = arith.constant 0 : index
    %c0_0 = arith.constant 0 : index
    %0 = vector.load %arg3[%c0, %c0_0] : memref<1x128xf32, #tpu.memory_space<vmem>>, vector<1x128xf32>
    %1 = vector.shape_cast %0 : vector<1x128xf32> to vector<1x1x1x128xf32>
    %c0_1 = arith.constant 0 : index
    %c0_2 = arith.constant 0 : index
    %2 = vector.load %arg4[%c0_1, %c0_2] : memref<1x128xf32, #tpu.memory_space<vmem>>, vector<1x128xf32>
    %3 = vector.shape_cast %2 : vector<1x128xf32> to vector<1x1x1x128xf32>
    %c0_3 = arith.constant 0 : index
    %c0_4 = arith.constant 0 : index
    %c0_5 = arith.constant 0 : index
    %c0_6 = arith.constant 0 : index
    %4 = vector.load %arg2[%c0_3, %c0_4, %c0_5, %c0_6] : memref<1x8x16x128xf32, #tpu.memory_space<vmem>>, vector<1x8x16x128xf32>
    %5 = vector.broadcast %1 : vector<1x1x1x128xf32> to vector<1x8x16x128xf32>
    %6 = arith.mulf %4, %5 : vector<1x8x16x128xf32>
    %7 = vector.broadcast %3 : vector<1x1x1x128xf32> to vector<1x8x16x128xf32>
    %8 = arith.addf %6, %7 : vector<1x8x16x128xf32>
    %cst = arith.constant 0.000000e+00 : f32
    %9 = vector.broadcast %cst : f32 to vector<1x8x16x128xf32>
    %10 = arith.maximumf %8, %9 : vector<1x8x16x128xf32>
    %c0_7 = arith.constant 0 : index
    %c0_8 = arith.constant 0 : index
    %c0_9 = arith.constant 0 : index
    %c0_10 = arith.constant 0 : index
    %11 = vector.load %arg5[%c0_7, %c0_8, %c0_9, %c0_10] : memref<1x8x16x128xf32, #tpu.memory_space<vmem>>, vector<1x8x16x128xf32>
    tpu.vector_store %arg5[%c0_7, %c0_8, %c0_9, %c0_10], %10 {strides = array<i32>} : memref<1x8x16x128xf32, #tpu.memory_space<vmem>>, vector<1x8x16x128xf32>,
    return
  }
  func.func @transform_0(%arg0: i32, %arg1: i32) -> (i32, i32, i32, i32) {
    %c0_i32 = arith.constant 0 : i32
    %c0_i32_0 = arith.constant 0 : i32
    %c0_i32_1 = arith.constant 0 : i32
    return %arg0, %arg1, %c0_i32, %c0_i32_0 : i32, i32, i32, i32
  }
  func.func @transform_1(%arg0: i32, %arg1: i32) -> (i32, i32) {
    %c0_i32 = arith.constant 0 : i32
    %c0_i32_0 = arith.constant 0 : i32
    %c0_i32_1 = arith.constant 0 : i32
    return %c0_i32, %c0_i32_0 : i32, i32
  }
  func.func @transform_2(%arg0: i32, %arg1: i32) -> (i32, i32) {
    %c0_i32 = arith.constant 0 : i32
    %c0_i32_0 = arith.constant 0 : i32
    %c0_i32_1 = arith.constant 0 : i32
    return %c0_i32, %c0_i32_0 : i32, i32
  }
  func.func @transform_3(%arg0: i32, %arg1: i32) -> (i32, i32, i32, i32) {
    %c0_i32 = arith.constant 0 : i32
    %c0_i32_0 = arith.constant 0 : i32
    %c0_i32_1 = arith.constant 0 : i32
    return %arg0, %arg1, %c0_i32, %c0_i32_0 : i32, i32, i32, i32
  }
}

module attributes {stable_mosaic.version = 11 : i64} {
  func.func @_conv3x3_stats_kernel(%arg0: i32, %arg1: i32, %arg2: memref<1x8x18x128xf32, #tpu.memory_space<vmem>>, %arg3: memref<1x1x18x128xf32, #tpu.memory_space<vmem>>, %arg4: memref<1x1x18x128xf32, #tpu.memory_space<vmem>>, %arg5: memref<9x128x128xf32, #tpu.memory_space<vmem>>, %arg6: memref<1x128xf32, #tpu.memory_space<vmem>>, %arg7: memref<1x8x16x128xf32, #tpu.memory_space<vmem>>, %arg8: memref<1x1x2x128xf32, #tpu.memory_space<vmem>>) attributes {dimension_semantics = [#tpu.dimension_semantics<parallel>, #tpu.dimension_semantics<parallel>], iteration_bounds = array<i64: 2, 2>, scalar_prefetch = 0 : i64, scratch_operands = 0 : i64, tpu.core_type = #tpu.core_type<tc>, window_params = [{transform_indices = @transform_0, window_bounds = array<i64: 1, 8, 18, 128>}, {transform_indices = @transform_1, window_bounds = array<i64: 1, 1, 18, 128>}, {transform_indices = @transform_2, window_bounds = array<i64: 1, 1, 18, 128>}, {pipeline_mode = #tpu.pipeline_mode<synchronous>, transform_indices = @transform_3, window_bounds = array<i64: 9, 128, 128>}, {pipeline_mode = #tpu.pipeline_mode<synchronous>, transform_indices = @transform_4, window_bounds = array<i64: 1, 128>}, {transform_indices = @transform_5, window_bounds = array<i64: 1, 8, 16, 128>}, {transform_indices = @transform_6, window_bounds = array<i64: 1, 1, 2, 128>}]} {
    %c0 = arith.constant 0 : index
    %c0_0 = arith.constant 0 : index
    %c0_1 = arith.constant 0 : index
    %c0_2 = arith.constant 0 : index
    %0 = vector.load %arg2[%c0, %c0_0, %c0_1, %c0_2] : memref<1x8x18x128xf32, #tpu.memory_space<vmem>>, vector<1x8x18x128xf32>
    %1 = vector.shape_cast %0 : vector<1x8x18x128xf32> to vector<8x18x128xf32>
    %c0_3 = arith.constant 0 : index
    %c0_4 = arith.constant 0 : index
    %c0_5 = arith.constant 0 : index
    %c0_6 = arith.constant 0 : index
    %2 = vector.load %arg3[%c0_3, %c0_4, %c0_5, %c0_6] : memref<1x1x18x128xf32, #tpu.memory_space<vmem>>, vector<1x1x18x128xf32>
    %3 = vector.shape_cast %2 : vector<1x1x18x128xf32> to vector<1x18x128xf32>
    %c0_7 = arith.constant 0 : index
    %c0_8 = arith.constant 0 : index
    %c0_9 = arith.constant 0 : index
    %c0_10 = arith.constant 0 : index
    %4 = vector.load %arg4[%c0_7, %c0_8, %c0_9, %c0_10] : memref<1x1x18x128xf32, #tpu.memory_space<vmem>>, vector<1x1x18x128xf32>
    %5 = vector.shape_cast %4 : vector<1x1x18x128xf32> to vector<1x18x128xf32>
    %6 = tpu.concatenate %1, %3, %5 in 0 : vector<8x18x128xf32>, vector<1x18x128xf32>, vector<1x18x128xf32> -> vector<10x18x128xf32>
    %cst = arith.constant 0.000000e+00 : f32
    %7 = vector.broadcast %cst : f32 to vector<128x128xf32>
    %8 = vector.extract_strided_slice %6 {offsets = [0, 0, 0], sizes = [8, 16, 128], strides = [1, 1, 1]} : vector<10x18x128xf32> to vector<8x16x128xf32>
    %9 = vector.shape_cast %8 : vector<8x16x128xf32> to vector<128x128xf32>
    %c0_11 = arith.constant 0 : index
    %c0_12 = arith.constant 0 : index
    %c0_13 = arith.constant 0 : index
    %10 = vector.load %arg5[%c0_11, %c0_12, %c0_13] : memref<9x128x128xf32, #tpu.memory_space<vmem>>, vector<1x128x128xf32>
    %11 = vector.shape_cast %10 : vector<1x128x128xf32> to vector<128x128xf32>
    %cst_14 = arith.constant dense<0.000000e+00> : vector<128x128xf32>
    %12 = tpu.matmul %9, %11, %cst_14 {dimension_numbers = #tpu.dot_dimension_numbers<[1], [0], [0], [1], [0, 0, 1, 1], [], []>} : vector<128x128xf32>, vector<128x128xf32>, vector<128x128xf32> -> vector<128x128xf32>
    %13 = arith.addf %7, %12 : vector<128x128xf32>
    %14 = vector.extract_strided_slice %6 {offsets = [0, 1, 0], sizes = [8, 16, 128], strides = [1, 1, 1]} : vector<10x18x128xf32> to vector<8x16x128xf32>
    %15 = vector.shape_cast %14 : vector<8x16x128xf32> to vector<128x128xf32>
    %c1 = arith.constant 1 : index
    %c0_15 = arith.constant 0 : index
    %c0_16 = arith.constant 0 : index
    %16 = vector.load %arg5[%c1, %c0_15, %c0_16] : memref<9x128x128xf32, #tpu.memory_space<vmem>>, vector<1x128x128xf32>
    %17 = vector.shape_cast %16 : vector<1x128x128xf32> to vector<128x128xf32>
    %cst_17 = arith.constant dense<0.000000e+00> : vector<128x128xf32>
    %18 = tpu.matmul %15, %17, %cst_17 {dimension_numbers = #tpu.dot_dimension_numbers<[1], [0], [0], [1], [0, 0, 1, 1], [], []>} : vector<128x128xf32>, vector<128x128xf32>, vector<128x128xf32> -> vector<128x128xf32>
    %19 = arith.addf %13, %18 : vector<128x128xf32>
    %20 = vector.extract_strided_slice %6 {offsets = [0, 2, 0], sizes = [8, 16, 128], strides = [1, 1, 1]} : vector<10x18x128xf32> to vector<8x16x128xf32>
    %21 = vector.shape_cast %20 : vector<8x16x128xf32> to vector<128x128xf32>
    %c2 = arith.constant 2 : index
    %c0_18 = arith.constant 0 : index
    %c0_19 = arith.constant 0 : index
    %22 = vector.load %arg5[%c2, %c0_18, %c0_19] : memref<9x128x128xf32, #tpu.memory_space<vmem>>, vector<1x128x128xf32>
    %23 = vector.shape_cast %22 : vector<1x128x128xf32> to vector<128x128xf32>
    %cst_20 = arith.constant dense<0.000000e+00> : vector<128x128xf32>
    %24 = tpu.matmul %21, %23, %cst_20 {dimension_numbers = #tpu.dot_dimension_numbers<[1], [0], [0], [1], [0, 0, 1, 1], [], []>} : vector<128x128xf32>, vector<128x128xf32>, vector<128x128xf32> -> vector<128x128xf32>
    %25 = arith.addf %19, %24 : vector<128x128xf32>
    %26 = vector.extract_strided_slice %6 {offsets = [1, 0, 0], sizes = [8, 16, 128], strides = [1, 1, 1]} : vector<10x18x128xf32> to vector<8x16x128xf32>
    %27 = vector.shape_cast %26 : vector<8x16x128xf32> to vector<128x128xf32>
    %c3 = arith.constant 3 : index
    %c0_21 = arith.constant 0 : index
    %c0_22 = arith.constant 0 : index
    %28 = vector.load %arg5[%c3, %c0_21, %c0_22] : memref<9x128x128xf32, #tpu.memory_space<vmem>>, vector<1x128x128xf32>
    %29 = vector.shape_cast %28 : vector<1x128x128xf32> to vector<128x128xf32>
    %cst_23 = arith.constant dense<0.000000e+00> : vector<128x128xf32>
    %30 = tpu.matmul %27, %29, %cst_23 {dimension_numbers = #tpu.dot_dimension_numbers<[1], [0], [0], [1], [0, 0, 1, 1], [], []>} : vector<128x128xf32>, vector<128x128xf32>, vector<128x128xf32> -> vector<128x128xf32>
    %31 = arith.addf %25, %30 : vector<128x128xf32>
    %32 = vector.extract_strided_slice %6 {offsets = [1, 1, 0], sizes = [8, 16, 128], strides = [1, 1, 1]} : vector<10x18x128xf32> to vector<8x16x128xf32>
    %33 = vector.shape_cast %32 : vector<8x16x128xf32> to vector<128x128xf32>
    %c4 = arith.constant 4 : index
    %c0_24 = arith.constant 0 : index
    %c0_25 = arith.constant 0 : index
    %34 = vector.load %arg5[%c4, %c0_24, %c0_25] : memref<9x128x128xf32, #tpu.memory_space<vmem>>, vector<1x128x128xf32>
    %35 = vector.shape_cast %34 : vector<1x128x128xf32> to vector<128x128xf32>
    %cst_26 = arith.constant dense<0.000000e+00> : vector<128x128xf32>
    %36 = tpu.matmul %33, %35, %cst_26 {dimension_numbers = #tpu.dot_dimension_numbers<[1], [0], [0], [1], [0, 0, 1, 1], [], []>} : vector<128x128xf32>, vector<128x128xf32>, vector<128x128xf32> -> vector<128x128xf32>
    %37 = arith.addf %31, %36 : vector<128x128xf32>
    %38 = vector.extract_strided_slice %6 {offsets = [1, 2, 0], sizes = [8, 16, 128], strides = [1, 1, 1]} : vector<10x18x128xf32> to vector<8x16x128xf32>
    %39 = vector.shape_cast %38 : vector<8x16x128xf32> to vector<128x128xf32>
    %c5 = arith.constant 5 : index
    %c0_27 = arith.constant 0 : index
    %c0_28 = arith.constant 0 : index
    %40 = vector.load %arg5[%c5, %c0_27, %c0_28] : memref<9x128x128xf32, #tpu.memory_space<vmem>>, vector<1x128x128xf32>
    %41 = vector.shape_cast %40 : vector<1x128x128xf32> to vector<128x128xf32>
    %cst_29 = arith.constant dense<0.000000e+00> : vector<128x128xf32>
    %42 = tpu.matmul %39, %41, %cst_29 {dimension_numbers = #tpu.dot_dimension_numbers<[1], [0], [0], [1], [0, 0, 1, 1], [], []>} : vector<128x128xf32>, vector<128x128xf32>, vector<128x128xf32> -> vector<128x128xf32>
    %43 = arith.addf %37, %42 : vector<128x128xf32>
    %44 = vector.extract_strided_slice %6 {offsets = [2, 0, 0], sizes = [8, 16, 128], strides = [1, 1, 1]} : vector<10x18x128xf32> to vector<8x16x128xf32>
    %45 = vector.shape_cast %44 : vector<8x16x128xf32> to vector<128x128xf32>
    %c6 = arith.constant 6 : index
    %c0_30 = arith.constant 0 : index
    %c0_31 = arith.constant 0 : index
    %46 = vector.load %arg5[%c6, %c0_30, %c0_31] : memref<9x128x128xf32, #tpu.memory_space<vmem>>, vector<1x128x128xf32>
    %47 = vector.shape_cast %46 : vector<1x128x128xf32> to vector<128x128xf32>
    %cst_32 = arith.constant dense<0.000000e+00> : vector<128x128xf32>
    %48 = tpu.matmul %45, %47, %cst_32 {dimension_numbers = #tpu.dot_dimension_numbers<[1], [0], [0], [1], [0, 0, 1, 1], [], []>} : vector<128x128xf32>, vector<128x128xf32>, vector<128x128xf32> -> vector<128x128xf32>
    %49 = arith.addf %43, %48 : vector<128x128xf32>
    %50 = vector.extract_strided_slice %6 {offsets = [2, 1, 0], sizes = [8, 16, 128], strides = [1, 1, 1]} : vector<10x18x128xf32> to vector<8x16x128xf32>
    %51 = vector.shape_cast %50 : vector<8x16x128xf32> to vector<128x128xf32>
    %c7 = arith.constant 7 : index
    %c0_33 = arith.constant 0 : index
    %c0_34 = arith.constant 0 : index
    %52 = vector.load %arg5[%c7, %c0_33, %c0_34] : memref<9x128x128xf32, #tpu.memory_space<vmem>>, vector<1x128x128xf32>
    %53 = vector.shape_cast %52 : vector<1x128x128xf32> to vector<128x128xf32>
    %cst_35 = arith.constant dense<0.000000e+00> : vector<128x128xf32>
    %54 = tpu.matmul %51, %53, %cst_35 {dimension_numbers = #tpu.dot_dimension_numbers<[1], [0], [0], [1], [0, 0, 1, 1], [], []>} : vector<128x128xf32>, vector<128x128xf32>, vector<128x128xf32> -> vector<128x128xf32>
    %55 = arith.addf %49, %54 : vector<128x128xf32>
    %56 = vector.extract_strided_slice %6 {offsets = [2, 2, 0], sizes = [8, 16, 128], strides = [1, 1, 1]} : vector<10x18x128xf32> to vector<8x16x128xf32>
    %57 = vector.shape_cast %56 : vector<8x16x128xf32> to vector<128x128xf32>
    %c8 = arith.constant 8 : index
    %c0_36 = arith.constant 0 : index
    %c0_37 = arith.constant 0 : index
    %58 = vector.load %arg5[%c8, %c0_36, %c0_37] : memref<9x128x128xf32, #tpu.memory_space<vmem>>, vector<1x128x128xf32>
    %59 = vector.shape_cast %58 : vector<1x128x128xf32> to vector<128x128xf32>
    %cst_38 = arith.constant dense<0.000000e+00> : vector<128x128xf32>
    %60 = tpu.matmul %57, %59, %cst_38 {dimension_numbers = #tpu.dot_dimension_numbers<[1], [0], [0], [1], [0, 0, 1, 1], [], []>} : vector<128x128xf32>, vector<128x128xf32>, vector<128x128xf32> -> vector<128x128xf32>
    %61 = arith.addf %55, %60 : vector<128x128xf32>
    %c0_39 = arith.constant 0 : index
    %c0_40 = arith.constant 0 : index
    %62 = vector.load %arg6[%c0_39, %c0_40] : memref<1x128xf32, #tpu.memory_space<vmem>>, vector<1x128xf32>
    %63 = vector.broadcast %62 : vector<1x128xf32> to vector<128x128xf32>
    %64 = arith.addf %61, %63 : vector<128x128xf32>
    %65 = vector.shape_cast %64 : vector<128x128xf32> to vector<1x8x16x128xf32>
    %c0_41 = arith.constant 0 : index
    %c0_42 = arith.constant 0 : index
    %c0_43 = arith.constant 0 : index
    %c0_44 = arith.constant 0 : index
    %66 = vector.load %arg7[%c0_41, %c0_42, %c0_43, %c0_44] : memref<1x8x16x128xf32, #tpu.memory_space<vmem>>, vector<1x8x16x128xf32>
    tpu.vector_store %arg7[%c0_41, %c0_42, %c0_43, %c0_44], %65 {strides = array<i32>} : memref<1x8x16x128xf32, #tpu.memory_space<vmem>>, vector<1x8x16x128xf32>,
    %cst_45 = arith.constant dense<0.000000e+00> : vector<128xf32>
    %67 = vector.multi_reduction <add>, %64, %cst_45 [0] : vector<128x128xf32> to vector<128xf32>
    %68 = vector.shape_cast %67 : vector<128xf32> to vector<1x128xf32>
    %69 = arith.mulf %64, %64 : vector<128x128xf32>
    %cst_46 = arith.constant dense<0.000000e+00> : vector<128xf32>
    %70 = vector.multi_reduction <add>, %69, %cst_46 [0] : vector<128x128xf32> to vector<128xf32>
    %71 = vector.shape_cast %70 : vector<128xf32> to vector<1x128xf32>
    %72 = tpu.concatenate %68, %71 in 0 : vector<1x128xf32>, vector<1x128xf32> -> vector<2x128xf32>
    %73 = vector.shape_cast %72 : vector<2x128xf32> to vector<1x1x2x128xf32>
    %c0_47 = arith.constant 0 : index
    %c0_48 = arith.constant 0 : index
    %c0_49 = arith.constant 0 : index
    %c0_50 = arith.constant 0 : index
    %74 = vector.load %arg8[%c0_47, %c0_48, %c0_49, %c0_50] : memref<1x1x2x128xf32, #tpu.memory_space<vmem>>, vector<1x1x2x128xf32>
    tpu.vector_store %arg8[%c0_47, %c0_48, %c0_49, %c0_50], %73 {strides = array<i32>} : memref<1x1x2x128xf32, #tpu.memory_space<vmem>>, vector<1x1x2x128xf32>,
    return
  }
  func.func @transform_0(%arg0: i32, %arg1: i32) -> (i32, i32, i32, i32) {
    %c0_i32 = arith.constant 0 : i32
    %c0_i32_0 = arith.constant 0 : i32
    %c0_i32_1 = arith.constant 0 : i32
    return %arg0, %arg1, %c0_i32, %c0_i32_0 : i32, i32, i32, i32
  }
  func.func @transform_1(%arg0: i32, %arg1: i32) -> (i32, i32, i32, i32) {
    %c1_i32 = arith.constant 1 : i32
    %0 = arith.addi %arg1, %c1_i32 : i32
    %c8_i32 = arith.constant 8 : i32
    %1 = arith.muli %0, %c8_i32 : i32
    %c0_i32 = arith.constant 0 : i32
    %c0_i32_0 = arith.constant 0 : i32
    %c0_i32_1 = arith.constant 0 : i32
    return %arg0, %1, %c0_i32, %c0_i32_0 : i32, i32, i32, i32
  }
  func.func @transform_2(%arg0: i32, %arg1: i32) -> (i32, i32, i32, i32) {
    %c1_i32 = arith.constant 1 : i32
    %0 = arith.addi %arg1, %c1_i32 : i32
    %c8_i32 = arith.constant 8 : i32
    %1 = arith.muli %0, %c8_i32 : i32
    %c1_i32_0 = arith.constant 1 : i32
    %2 = arith.addi %1, %c1_i32_0 : i32
    %c0_i32 = arith.constant 0 : i32
    %c0_i32_1 = arith.constant 0 : i32
    %c0_i32_2 = arith.constant 0 : i32
    return %arg0, %2, %c0_i32, %c0_i32_1 : i32, i32, i32, i32
  }
  func.func @transform_3(%arg0: i32, %arg1: i32) -> (i32, i32, i32) {
    %c0_i32 = arith.constant 0 : i32
    %c0_i32_0 = arith.constant 0 : i32
    %c0_i32_1 = arith.constant 0 : i32
    %c0_i32_2 = arith.constant 0 : i32
    return %c0_i32, %c0_i32_0, %c0_i32_1 : i32, i32, i32
  }
  func.func @transform_4(%arg0: i32, %arg1: i32) -> (i32, i32) {
    %c0_i32 = arith.constant 0 : i32
    %c0_i32_0 = arith.constant 0 : i32
    %c0_i32_1 = arith.constant 0 : i32
    return %c0_i32, %c0_i32_0 : i32, i32
  }
  func.func @transform_5(%arg0: i32, %arg1: i32) -> (i32, i32, i32, i32) {
    %c0_i32 = arith.constant 0 : i32
    %c0_i32_0 = arith.constant 0 : i32
    %c0_i32_1 = arith.constant 0 : i32
    return %arg0, %arg1, %c0_i32, %c0_i32_0 : i32, i32, i32, i32
  }
  func.func @transform_6(%arg0: i32, %arg1: i32) -> (i32, i32, i32, i32) {
    %c0_i32 = arith.constant 0 : i32
    %c0_i32_0 = arith.constant 0 : i32
    %c0_i32_1 = arith.constant 0 : i32
    return %arg0, %arg1, %c0_i32, %c0_i32_0 : i32, i32, i32, i32
  }
}

</mosaic_0001>

<bundles_post_ra>
// kernel: double_conv.5
= control target key start
LH: loop header
LB: loop body
LE: loop exit
PB: predicated region body
PF: predicated region fallthrough
CT: control target
= control target key end

     0   :  { %s519_s12 = smov 0   ;;  %s521_s13 = smov 0   ;;  %s630_s0 = inlined_call_operand.vmem [shape: f32[2,16,16,128], index: 0, kind: input, shape index: {}]   ;;  %s631_s1 = inlined_call_operand.vmem [shape: f32[1,128], index: 1, kind: input, shape index: {}]   ;;  %s632_s2 = inlined_call_operand.vmem [shape: f32[1,128], index: 2, kind: input, shape index: {}]   ;;  %s633_s3 = inlined_call_operand.vmem [shape: f32[2,16,16,128], index: 3, kind: output, shape index: {}]  }
   0x1   :  { %s523_s14 = smov 0   ;;  %s525_s15 = smov 0  }
   0x2   :  { %s527_s16 = smov 0  }
   0x3 LB: > { %s22_s17 = sadd.s32 1, %s489_s14  ;;  %s25_s18 = sadd.s32 1, %s493_s15  ;;  %s497_s16 = sphi %s527_s16, %s13_s16   ;;  %s493_s15 = sphi %s525_s15, %s637_s15   ;;  %s489_s14 = sphi %s523_s14, %s636_s14   ;;  %s485_s13 = sphi %s521_s13, %s635_s13   ;;  %s481_s12 = sphi %s519_s12, %s634_s12  }
   0x4   : > { %p23_p0 = scmp.ge.s32.totalorder %s22_s17, 2  ;;  %p406_p1 = scmp.ge.s32.totalorder %s497_s16, 1 }
   0x5   : > { %p159_p2 = scmp.lt.s32.totalorder %s497_s16, 5 }
   0x6   : > { %s639_s17 = smov (%p23_p0, %s22_s17), 0  ;;  %s641_s18 = smov (!%p23_p0, %s25_s18), %s493_s15 }
   0x7   : > { %p160_p3 = pnand %p406_p1, %p159_p2  ;;  %p27_p4 = scmp.ge.s32.totalorder %s641_s18, 2 }
   0x8   : > { %s407_s19 = sshll.u32 (!%p160_p3), %s481_s12, 3  ;;  %p194_p5 = scmp.lt.s32.totalorder (!%p160_p3), %s485_s13, 1 }
   0x9   : > { %s643_s18 = smov (%p27_p4, %s641_s18), 0  ;;  %163 = sbr.rel (%p160_p3) target bundleno = 42 (0x2a), region = 32 }
   0xa   : > { %p196_p6 = scmp.lt.s32.totalorder (!%p160_p3), %s407_s19, 15 }
   0xe   : > { %s645_s13 = smov (!%p194_p5, %s485_s13), 1  ;;  %s647_s19 = smov (!%p196_p6, %s407_s19), 15  ;;  %v457_v0 = vld [vmem:[%s631_s1] ss:$0 sm:$0xff] }
   0xf   : > { %s409_s20 = sshll.u32 %s645_s13, 5  ;;  %s408_s21 = sshll.u32 %s647_s19, 1  ;;  %v560_v1 = vld [vmem:[%s632_s2] ss:$0 sm:$0xff] }
  0x10   : > { %s200_s22 = sadd.s32 %s409_s20, %s408_s21 }
  0x11   : > { %s410_s25 = sshll.u32 %s200_s22, 3 }
  0x12   : > { %s555_s28 = scalar_lea.vmem %s630_s0, %s410_s25  ;;  %s576_s6 = scalar_lea.vmem %s633_s3, %s410_s25 }
  0x13   : > { %v217_v2 = vld [vmem:[%s555_s28] sm:$0xff]  ;;  %v218_v3 = vld [vmem:[%s555_s28 + $0x8] sm:$0xff]  ;;  %v219_v4 = vld [vmem:[%s555_s28 + $0x10] sm:$0xff] }
  0x14   : > { %v236_v5 = vmul.f32 %v457_v0, %v217_v2  ;;  %v237_v6 = vmul.f32 %v457_v0, %v218_v3  ;;  %v238_v7 = vmul.f32 %v457_v0, %v219_v4  ;;  %v220_v8 = vld [vmem:[%s555_s28 + $0x18] sm:$0xff]  ;;  %v221_v9 = vld [vmem:[%s555_s28 + $0x20] sm:$0xff]  ;;  %v222_v10 = vld [vmem:[%s555_s28 + $0x28] sm:$0xff] }
  0x15   : > { %v239_v11 = vmul.f32 %v457_v0, %v220_v8  ;;  %v240_v12 = vmul.f32 %v457_v0, %v221_v9  ;;  %v241_v13 = vmul.f32 %v457_v0, %v222_v10  ;;  %v223_v14 = vld [vmem:[%s555_s28 + $0x30] sm:$0xff]  ;;  %v224_v15 = vld [vmem:[%s555_s28 + $0x38] sm:$0xff]  ;;  %v225_v24 = vld [vmem:[%s555_s28 + $0x40] sm:$0xff] }
  0x16   : > { %v255_v16 = vadd.f32 %v560_v1, %v236_v5  ;;  %v256_v17 = vadd.f32 %v560_v1, %v237_v6  ;;  %v257_v18 = vadd.f32 %v560_v1, %v238_v7  ;;  %v242_v19 = vmul.f32 %v457_v0, %v223_v14  ;;  %v226_v25 = vld [vmem:[%s555_s28 + $0x48] sm:$0xff]  ;;  %v227_v26 = vld [vmem:[%s555_s28 + $0x50] sm:$0xff]  ;;  %v228_v31 = vld [vmem:[%s555_s28 + $0x58] sm:$0xff] }
  0x17   : > { %v258_v20 = vadd.f32 %v560_v1, %v239_v11  ;;  %v259_v21 = vadd.f32 %v560_v1, %v240_v12  ;;  %v260_v22 = vadd.f32 %v560_v1, %v241_v13  ;;  %v243_v23 = vmul.f32 %v457_v0, %v224_v15  ;;  %v229_v32 = vld [vmem:[%s555_s28 + $0x60] sm:$0xff]  ;;  %v230_v33 = vld [vmem:[%s555_s28 + $0x68] sm:$0xff]  ;;  %v231_v37 = vld [vmem:[%s555_s28 + $0x70] sm:$0xff] }
  0x18   : > { %v271_v27 = vmax.f32 %v255_v16, 0.0  ;;  %v272_v28 = vmax.f32 %v256_v17, 0.0  ;;  %v273_v29 = vmax.f32 %v257_v18, 0.0  ;;  %v261_v30 = vadd.f32 %v560_v1, %v242_v19  ;;  %v232_v42 = vld [vmem:[%s555_s28 + $0x78] sm:$0xff] }
  0x19   : > { %v274_v34 = vmax.f32 %v258_v20, 0.0  ;;  %v275_v35 = vmax.f32 %v259_v21, 0.0  ;;  %v262_v36 = vadd.f32 %v560_v1, %v243_v23  ;;  %v276_v38 = vmax.f32 %v260_v22, 0.0 }
  0x1a   : > { %287 = vst [vmem:[%s576_s6] sm:$0xff] %v271_v27  ;;  %v244_v39 = vmul.f32 %v457_v0, %v225_v24  ;;  %v245_v40 = vmul.f32 %v457_v0, %v226_v25  ;;  %v246_v41 = vmul.f32 %v457_v0, %v227_v26  ;;  %v277_v43 = vmax.f32 %v261_v30, 0.0 }
  0x1b   : > { %288 = vst [vmem:[%s576_s6 + $0x8] sm:$0xff] %v272_v28  ;;  %v247_v44 = vmul.f32 %v457_v0, %v228_v31  ;;  %v248_v45 = vmul.f32 %v457_v0, %v229_v32  ;;  %v249_v46 = vmul.f32 %v457_v0, %v230_v33  ;;  %v250_v50 = vmul.f32 %v457_v0, %v231_v37 }
  0x1c   : > { %289 = vst [vmem:[%s576_s6 + $0x10] sm:$0xff] %v273_v29  ;;  %v263_v47 = vadd.f32 %v560_v1, %v244_v39  ;;  %v264_v48 = vadd.f32 %v560_v1, %v245_v40  ;;  %v265_v49 = vadd.f32 %v560_v1, %v246_v41  ;;  %v278_v51 = vmax.f32 %v262_v36, 0.0 }
  0x1d   : > { %290 = vst [vmem:[%s576_s6 + $0x18] sm:$0xff] %v274_v34  ;;  %v266_v52 = vadd.f32 %v560_v1, %v247_v44  ;;  %v251_v53 = vmul.f32 %v457_v0, %v232_v42  ;;  %v267_v55 = vadd.f32 %v560_v1, %v248_v45  ;;  %v268_v57 = vadd.f32 %v560_v1, %v249_v46 }
  0x1e   : > { %291 = vst [vmem:[%s576_s6 + $0x20] sm:$0xff] %v275_v35  ;;  %v279_v54 = vmax.f32 %v263_v47, 0.0  ;;  %v280_v56 = vmax.f32 %v264_v48, 0.0  ;;  %v281_v58 = vmax.f32 %v265_v49, 0.0  ;;  %v269_v59 = vadd.f32 %v560_v1, %v250_v50 }
  0x1f   : > { %292 = vst [vmem:[%s576_s6 + $0x28] sm:$0xff] %v276_v38  ;;  %v282_v60 = vmax.f32 %v266_v52, 0.0  ;;  %v270_v61 = vadd.f32 %v560_v1, %v251_v53  ;;  %v283_v62 = vmax.f32 %v267_v55, 0.0  ;;  %v284_v63 = vmax.f32 %v268_v57, 0.0 }
  0x20   : > { %293 = vst [vmem:[%s576_s6 + $0x30] sm:$0xff] %v277_v43  ;;  %v285_v0 = vmax.f32 %v269_v59, 0.0 }
  0x21   : > { %294 = vst [vmem:[%s576_s6 + $0x38] sm:$0xff] %v278_v51  ;;  %v286_v2 = vmax.f32 %v270_v61, 0.0 }
  0x22   : > { %295 = vst [vmem:[%s576_s6 + $0x40] sm:$0xff] %v279_v54 }
  0x23   : > { %296 = vst [vmem:[%s576_s6 + $0x48] sm:$0xff] %v280_v56 }
  0x24   : > { %297 = vst [vmem:[%s576_s6 + $0x50] sm:$0xff] %v281_v58 }
  0x25   : > { %298 = vst [vmem:[%s576_s6 + $0x58] sm:$0xff] %v282_v60 }
  0x26   : > { %299 = vst [vmem:[%s576_s6 + $0x60] sm:$0xff] %v283_v62 }
  0x27   : > { %300 = vst [vmem:[%s576_s6 + $0x68] sm:$0xff] %v284_v63 }
  0x28   : > { %301 = vst [vmem:[%s576_s6 + $0x70] sm:$0xff] %v285_v0 }
  0x29   : > { %302 = vst [vmem:[%s576_s6 + $0x78] sm:$0xff] %v286_v2 }
  0x2a PF: > { %s13_s16 = sadd.s32 1, %s497_s16   ;;  %s634_s12 = smov %s489_s14 }
  0x2b   : > { %p10_p7 = scmp.ge.s32.totalorder %s13_s16, 6   ;;  %s635_s13 = smov %s493_s15 }
  0x2c   : > { %s636_s14 = smov %s639_s17  ;;  %s637_s15 = smov %s643_s18 }
  0x2d   :  { %12 = sbr.rel (!%p10_p7) target bundleno = 3 (0x3), region = 62 }

// kernel: double_conv.4
= control target key start
LH: loop header
LB: loop body
LE: loop exit
PB: predicated region body
PF: predicated region fallthrough
CT: control target
= control target key end

     0   :  { %s2117_s21 = smov 0   ;;  %s2119_s22 = smov 0   ;;  %s3163_s0 = inlined_call_operand.vmem [shape: f32[2,18,18,128], index: 0, kind: input, shape index: {}, may-alias: {0,1,2}]   ;;  %s3164_s1 = inlined_call_operand.vmem [shape: f32[2,18,18,128], index: 1, kind: input, shape index: {}, may-alias: {0,1,2}]   ;;  %s3165_s2 = inlined_call_operand.vmem [shape: f32[2,18,18,128], index: 2, kind: input, shape index: {}, may-alias: {0,1,2}]   ;;  %s3166_s3 = inlined_call_operand.vmem [shape: f32[9,128,128], index: 3, kind: input, shape index: {}]   ;;  %s3167_s4 = inlined_call_operand.vmem [shape: f32[1,128], index: 4, kind: input, shape index: {}]   ;;  %s3168_s5 = inlined_call_operand.vmem [shape: f32[2,16,16,128], index: 5, kind: output, shape index: {0}]   ;;  %s3169_s6 = inlined_call_operand.vmem [shape: f32[2,2,2,128], index: 6, kind: output, shape index: {1}]  }
   0x1   :  { %s2121_s23 = smov 0   ;;  %s2123_s24 = smov 0  }
   0x2   :  { %s2125_s25 = smov 0  }
   0x3 LB: > { %s26_s26 = sadd.s32 1, %s2072_s23  ;;  %s29_s27 = sadd.s32 1, %s2076_s24  ;;  %s2080_s25 = sphi %s2125_s25, %s17_s25   ;;  %s2076_s24 = sphi %s2123_s24, %s3173_s24   ;;  %s2072_s23 = sphi %s2121_s23, %s3172_s23   ;;  %s2068_s22 = sphi %s2119_s22, %s3171_s22   ;;  %s2064_s21 = sphi %s2117_s21, %s3170_s21  }
   0x4   : > { %p27_p0 = scmp.ge.s32.totalorder %s26_s26, 2  ;;  %p1789_p1 = scmp.ge.s32.totalorder %s2080_s25, 1 }
   0x5   : > { %p301_p2 = scmp.lt.s32.totalorder %s2080_s25, 5 }
   0x6   : > { %s3175_s26 = smov (%p27_p0, %s26_s26), 0  ;;  %s3177_s27 = smov (!%p27_p0, %s29_s27), %s2076_s24 }
   0x7   : > { %p302_p3 = pnand %p1789_p1, %p301_p2  ;;  %p31_p4 = scmp.ge.s32.totalorder %s3177_s27, 2 }
   0x8   : > { %s2156_s8 = sshll.u32 (!%p302_p3), %s2064_s21, 3  ;;  %p383_p5 = scmp.lt.s32.totalorder (!%p302_p3), %s2068_s22, 1 }
   0x9   : > { %s3179_s27 = smov (%p31_p4, %s3177_s27), 0  ;;  %305 = sbr.rel (%p302_p3) target bundleno = 490 (0x1ea), region = 40 }
   0xa   : > { %p385_p6 = scmp.lt.s32.totalorder (!%p302_p3), %s2156_s8, 17  ;;  %p429_p9 = scmp.lt.s32.totalorder (!%p302_p3), %s2156_s8, 15 }
   0xb   : > { %p439_p10 = scmp.lt.s32.totalorder (!%p302_p3), %s2064_s21, 1 }
   0xe   : > { %v1817_v0 = vld [vmem:[%s3166_s3 + $0xf8] sm:$0xff]  ;;  %v1816_v1 = vld [vmem:[%s3166_s3 + $0xf0] sm:$0xff]  ;;  %v1815_v2 = vld [vmem:[%s3166_s3 + $0xe8] sm:$0xff]  ;;  %s3181_s22 = smov (!%p383_p5, %s2068_s22), 1  ;;  %vm515_vm0 = vcmask 1046528   ;;  %vm719_vm1 = vcmask 1045504  }
   0xf   : > { %1944 = vmatpush.msra.mxu1 %v1817_v0  ;;  %1945 = vmatpush.msra.mxu2 %v1817_v0  ;;  %v1814_v3 = vld [vmem:[%s3166_s3 + $0xe0] sm:$0xff]  ;;  %s386_s13 = scalar_select %p385_p6, %s2156_s8, 17  ;;  %v1813_v4 = vld [vmem:[%s3166_s3 + $0xd8] sm:$0xff]  ;;  %v1812_v5 = vld [vmem:[%s3166_s3 + $0xd0] sm:$0xff]  ;;  %vm1590_vm2 = vcmask 1040384  }
  0x10   : > { %1946 = vmatpush.msra.mxu3 %v1817_v0  ;;  %589 = vmatpush.msra.mxu0 %v1817_v0  ;;  %s2172_s16 = smul.u32 54, %s3181_s22  ;;  %v1811_v6 = vld [vmem:[%s3166_s3 + $0xc8] sm:$0xff]  ;;  %v1810_v7 = vld [vmem:[%s3166_s3 + $0xc0] sm:$0xff]  ;;  %v1809_v8 = vld [vmem:[%s3166_s3 + $0xb8] sm:$0xff]  ;;  %s3187_s21 = smov (!%p439_p10, %s2064_s21), 1 }
  0x11   : > { %1947 = vmatpush.msra.mxu1 %v1816_v1  ;;  %1948 = vmatpush.msra.mxu2 %v1816_v1  ;;  %s1992_s19 = smul.u32 3, %s386_s13  ;;  %v1808_v9 = vld [vmem:[%s3166_s3 + $0xb0] sm:$0xff]  ;;  %v1807_v10 = vld [vmem:[%s3166_s3 + $0xa8] sm:$0xff]  ;;  %v1806_v11 = vld [vmem:[%s3166_s3 + $0xa0] sm:$0xff] }
  0x12   : > { %1949 = vmatpush.msra.mxu3 %v1816_v1  ;;  %590 = vmatpush.msra.mxu0 %v1816_v1  ;;  %v1805_v12 = vld [vmem:[%s3166_s3 + $0x98] sm:$0xff]  ;;  %v1804_v17 = vld [vmem:[%s3166_s3 + $0x90] sm:$0xff]  ;;  %v1803_v24 = vld [vmem:[%s3166_s3 + $0x88] sm:$0xff] }
  0x13   : > { %1950 = vmatpush.msra.mxu1 %v1815_v2  ;;  %1951 = vmatpush.msra.mxu2 %v1815_v2  ;;  %s389_s7 = sadd.s32 %s2172_s16, %s1992_s19  ;;  %v1802_v27 = vld [vmem:[%s3166_s3 + $0x80] sm:$0xff]  ;;  %v1833_v32 = vld [vmem:[%s3166_s3 + $0x178] sm:$0xff]  ;;  %v1832_v39 = vld [vmem:[%s3166_s3 + $0x170] sm:$0xff] }
  0x14   : > { %1952 = vmatpush.msra.mxu3 %v1815_v2  ;;  %591 = vmatpush.msra.mxu0 %v1815_v2  ;;  %s1791_s11 = sshll.u32 %s389_s7, 3  ;;  %v490_v34 = vld [vmem:[%s3166_s3 + $0x78] sm:$0xff]  ;;  %v489_v41 = vld [vmem:[%s3166_s3 + $0x70] sm:$0xff]  ;;  %v1831_v44 = vld [vmem:[%s3166_s3 + $0x168] sm:$0xff]  ;;  %s2847_s7 = sadd.s32 8, %s2156_s8 }
  0x15   : > { %1953 = vmatpush.msra.mxu1 %v1814_v3  ;;  %1954 = vmatpush.msra.mxu2 %v1814_v3  ;;  %s2196_s19 = scalar_lea.vmem %s3163_s0, %s1791_s11  ;;  %v1849_v40 = vld [vmem:[%s3166_s3 + $0x1f8] sm:$0xff]  ;;  %v1848_v45 = vld [vmem:[%s3166_s3 + $0x1f0] sm:$0xff]  ;;  %v488_v47 = vld [vmem:[%s3166_s3 + $0x68] sm:$0xff]  ;;  %p402_p7 = scmp.lt.s32.totalorder %s2847_s7, 17 }
  0x16   : > { %1955 = vmatpush.msra.mxu3 %v1814_v3  ;;  %592 = vmatpush.msra.mxu0 %v1814_v3  ;;  %v2205_v13 = vld [vmem:[%s2196_s19 + $0x30] sm:$0xff]  ;;  %v2208_v14 = vld [vmem:[%s2196_s19 + $0x38] sm:$0xff]  ;;  %v2211_v15 = vld [vmem:[%s2196_s19 + $0x60] sm:$0xff]  ;;  %s413_s13 = sadd.s32 1, %s2847_s7  ;;  %s3185_s8 = smov (!%p429_p9, %s2156_s8), 15 }
  0x17   : > { %1956 = vmatpush.msra.mxu1 %v1813_v4  ;;  %1957 = vmatpush.msra.mxu2 %v1813_v4  ;;  %v2214_v16 = vld [vmem:[%s2196_s19 + $0x68] sm:$0xff]  ;;  %v2220_v18 = vld [vmem:[%s2196_s19 + $0x90] sm:$0xff]  ;;  %v2223_v19 = vld [vmem:[%s2196_s19 + $0x98] sm:$0xff]  ;;  %v526_v20 = vrot.slane %v2205_v13, 1  ;;  %v527_v21 = vrot.slane %v2208_v14, 1  ;;  %v536_v22 = vrot.slane %v2211_v15, 1 }
  0x18   : > { %1958 = vmatpush.msra.mxu3 %v1813_v4  ;;  %593 = vmatpush.msra.mxu0 %v1813_v4  ;;  %v537_v23 = vrot.slane %v2214_v16, 1  ;;  %v546_v25 = vrot.slane %v2220_v18, 1  ;;  %v547_v26 = vrot.slane %v2223_v19, 1  ;;  %v2238_v28 = vld [vmem:[%s2196_s19] sm:$0xff]  ;;  %v2241_v29 = vld [vmem:[%s2196_s19 + $0x8] sm:$0xff]  ;;  %v1829_v55 = vld [vmem:[%s3166_s3 + $0x158] sm:$0xff] }
  0x19   : > { %1959 = vmatpush.msra.mxu1 %v1812_v5  ;;  %1960 = vmatpush.msra.mxu2 %v1812_v5  ;;  %v2244_v30 = vsel %vm515_vm0, %v526_v20, %v527_v21  ;;  %v2253_v33 = vld [vmem:[%s2196_s19 + $0x70] sm:$0x3]  ;;  %v2262_v36 = vld [vmem:[%s2196_s19 + $0x40] sm:$0x3]  ;;  %v516_v37 = vrot.slane %v2238_v28, 1  ;;  %v517_v38 = vrot.slane %v2241_v29, 1 }
  0x1a   : > { %1961 = vmatpush.msra.mxu3 %v1812_v5  ;;  %594 = vmatpush.msra.mxu0 %v1812_v5  ;;  %v2247_v31 = vsel %vm515_vm0, %v536_v22, %v537_v23  ;;  %v2259_v35 = vsel %vm515_vm0, %v546_v25, %v547_v26  ;;  %v539_v42 = vrot.slane %v2253_v33, 1  ;;  %v2279_v43 = vld [vmem:[%s2196_s19 + $0xa0] sm:$0x3]  ;;  %v529_v46 = vrot.slane %v2262_v36, 1  ;;  %v1847_v50 = vld [vmem:[%s3166_s3 + $0x1e8] sm:$0xff]  ;;  %v486_v57 = vld [vmem:[%s3166_s3 + $0x58] sm:$0xff] }
  0x1b   : > { %1962 = vmatpush.msra.mxu1 %v1811_v6  ;;  %1963 = vmatpush.msra.mxu2 %v1811_v6  ;;  %v518_v48 = vsel %vm515_vm0, %v516_v37, %v517_v38  ;;  %v1830_v49 = vld [vmem:[%s3166_s3 + $0x160] sm:$0xff]  ;;  %v549_v51 = vrot.slane %v2279_v43, 1  ;;  %v2321_v58 = vld [vmem:[%s2196_s19 + $0x78] sm:$0xff]  ;;  %v1828_v61 = vld [vmem:[%s3166_s3 + $0x150] sm:$0xff]  ;;  %s403_s18 = scalar_select %p402_p7, %s2847_s7, 17 }
  0x1c   : > { %1964 = vmatpush.msra.mxu3 %v1811_v6  ;;  %595 = vmatpush.msra.mxu0 %v1811_v6  ;;  %v487_v52 = vld [vmem:[%s3166_s3 + $0x60] sm:$0xff]  ;;  %v2306_v53 = vsel %vm515_vm0, %v537_v23, %v539_v42  ;;  %v2309_v54 = vsel %vm515_vm0, %v527_v21, %v529_v46  ;;  %v2334_v62 = vld [vmem:[%s2196_s19 + $0x48] sm:$0xff]  ;;  %v2337_v63 = vld [vmem:[%s2196_s19 + $0x50] sm:$0xff]  ;;  %v541_v5 = vrot.slane %v2321_v58, 1  ;;  %p416_p8 = scmp.lt.s32.totalorder %s413_s13, 17 }
  0x1d   : > { %1965 = vmatpush.msra.mxu1 %v1810_v7  ;;  %1966 = vmatpush.msra.mxu2 %v1810_v7  ;;  %v1846_v56 = vld [vmem:[%s3166_s3 + $0x1e0] sm:$0xff]  ;;  %v2328_v60 = vsel %vm515_vm0, %v547_v26, %v549_v51  ;;  %v1845_v0 = vld [vmem:[%s3166_s3 + $0x1d8] sm:$0xff]  ;;  %v485_v2 = vld [vmem:[%s3166_s3 + $0x50] sm:$0xff]  ;;  %s1994_s20 = smul.u32 3, %s403_s18  ;;  %s1797_s18 = sshll.u32 %s3185_s8, 1 }
  0x1e   : > { %1967 = vmatpush.msra.mxu3 %v1810_v7  ;;  %596 = vmatpush.msra.mxu0 %v1810_v7  ;;  %v2324_v59 = vld [vmem:[%s2196_s19 + $0x80] sm:$0xff]  ;;  %v1865_v1 = vld [vmem:[%s3166_s3 + $0x278] sm:$0xff]  ;;  %v1827_v3 = vld [vmem:[%s3166_s3 + $0x148] sm:$0xff]  ;;  %s3183_s13 = smov (!%p416_p8, %s413_s13), 17 }
  0x1f   : > { %1968 = vmatpush.msra.mxu1 %v1809_v8  ;;  %1969 = vmatpush.msra.mxu2 %v1809_v8  ;;  %v1844_v4 = vld [vmem:[%s3166_s3 + $0x1d0] sm:$0xff]  ;;  %v542_v6 = vrot.slane %v2324_v59, 1  ;;  %v1826_v20 = vld [vmem:[%s3166_s3 + $0x140] sm:$0xff]  ;;  %v1843_v21 = vld [vmem:[%s3166_s3 + $0x1c8] sm:$0xff]  ;;  %s406_s30 = sadd.s32 %s1994_s20, %s2172_s16  ;;  %s1995_s7 = smul.u32 3, %s3183_s13 }
  0x20   : > { %1970 = vmatpush.msra.mxu3 %v1809_v8  ;;  %597 = vmatpush.msra.mxu0 %v1809_v8  ;;  %v2358_v7 = vld [vmem:[%s2196_s19 + $0x10] sm:$0x3]  ;;  %v1863_v22 = vld [vmem:[%s3166_s3 + $0x268] sm:$0xff]  ;;  %v1842_v37 = vld [vmem:[%s3166_s3 + $0x1c0] sm:$0xff]  ;;  %s1793_s9 = sshll.u32 %s406_s30, 3  ;;  %s1798_s20 = sshll.u32 %s3181_s22, 5 }
  0x21   : > { %1971 = vmatpush.msra.mxu1 %v1808_v9  ;;  %1972 = vmatpush.msra.mxu2 %v1808_v9  ;;  %v1864_v8 = vld [vmem:[%s3166_s3 + $0x270] sm:$0xff]  ;;  %v519_v23 = vrot.slane %v2358_v7, 1  ;;  %v2391_v25 = vsel %vm515_vm0, %v541_v5, %v542_v6  ;;  %v2417_v42 = vld [vmem:[%s2196_s19 + $0x88] sm:$0x3]  ;;  %v2429_v46 = vld [vmem:[%s2196_s19 + $0x58] sm:$0x3]  ;;  %s408_s12 = scalar_lea.vmem %s3164_s1, %s1793_s9  ;;  %s433_s28 = sadd.s32 %s1798_s20, %s1797_s18 }
  0x22   : > { %1973 = vmatpush.msra.mxu3 %v1808_v9  ;;  %598 = vmatpush.msra.mxu0 %v1808_v9  ;;  %v531_v9 = vrot.slane %v2334_v62, 1  ;;  %v2445_v51 = vld [vmem:[%s2196_s19 + $0x18] sm:$0xff]  ;;  %s1799_s29 = sshll.u32 %s433_s28, 3 }
  0x23   : > { %1974 = vmatpush.msra.mxu1 %v1807_v10  ;;  %1975 = vmatpush.msra.mxu2 %v1807_v10  ;;  %s3088_s11 = scalar_lea.vmem %s3168_s5, %s1799_s29 }
  0x24   : > { %1976 = vmatpush.msra.mxu3 %v1807_v10  ;;  %599 = vmatpush.msra.mxu0 %v1807_v10  ;;  %v532_v10 = vrot.slane %v2337_v63, 1 }
  0x25   : > { %1977 = vmatpush.msra.mxu1 %v1806_v11  ;;  %1978 = vmatpush.msra.mxu2 %v1806_v11 }
  0x26   : > { %1979 = vmatpush.msra.mxu3 %v1806_v11  ;;  %600 = vmatpush.msra.mxu0 %v1806_v11  ;;  %v2367_v11 = vld [vmem:[%s2196_s19 + $0xa8] sm:$0xff] }
  0x27   : > { %1980 = vmatpush.msra.mxu1 %v1805_v12  ;;  %1981 = vmatpush.msra.mxu2 %v1805_v12  ;;  %v551_v26 = vrot.slane %v2367_v11, 1 }
  0x28   : > { %1982 = vmatpush.msra.mxu3 %v1805_v12  ;;  %601 = vmatpush.msra.mxu0 %v1805_v12  ;;  %v2370_v12 = vld [vmem:[%s2196_s19 + $0xb0] sm:$0xff] }
  0x29   : > { %1983 = vmatpush.msra.mxu1 %v1804_v17  ;;  %1984 = vmatpush.msra.mxu2 %v1804_v17 }
  0x2a   : > { %1985 = vmatpush.msra.mxu3 %v1804_v17  ;;  %602 = vmatpush.msra.mxu0 %v1804_v17  ;;  %v484_v17 = vld [vmem:[%s3166_s3 + $0x48] sm:$0xff] }
  0x2b   : > { %1986 = vmatpush.msra.mxu1 %v1803_v24  ;;  %1987 = vmatpush.msra.mxu2 %v1803_v24 }
  0x2c   : > { %1988 = vmatpush.msra.mxu3 %v1803_v24  ;;  %603 = vmatpush.msra.mxu0 %v1803_v24  ;;  %v483_v24 = vld [vmem:[%s3166_s3 + $0x40] sm:$0xff] }
  0x2d   : > { %1989 = vmatpush.msra.mxu1 %v1802_v27  ;;  %1990 = vmatpush.msra.mxu2 %v1802_v27 }
  0x2e   : > { %617 = vmatmul.f32.vlgmr.msra.gmra.mxu1 %v2244_v30  ;;  %629 = vmatmul.f32.vlgmr.msra.gmra.mxu2 %v2247_v31 }
  0x2f   : > { %793 = vmatpush.msrb.mxu2 %v1833_v32  ;;  %1991 = vmatpush.msra.mxu3 %v1802_v27  ;;  %v2398_v32 = vsel %vm515_vm0, %v531_v9, %v532_v10 }
  0x30   : > { %654 = vmatpush.msrb.mxu1 %v490_v34  ;;  %641 = vmatmul.f32.vlgmr.msra.gmra.mxu3 %v2259_v35  ;;  %v1825_v34 = vld [vmem:[%s3166_s3 + $0x138] sm:$0xff] }
  0x31   : > { %794 = vmatpush.msrb.mxu2 %v1832_v39  ;;  %891 = vmatpush.msrb.mxu3 %v1849_v40  ;;  %v1862_v39 = vld [vmem:[%s3166_s3 + $0x260] sm:$0xff]  ;;  %v482_v40 = vld [vmem:[%s3166_s3 + $0x38] sm:$0xff] }
  0x32   : > { %655 = vmatpush.msrb.mxu1 %v489_v41  ;;  %604 = vmatpush.msra.mxu0 %v1802_v27  ;;  %v552_v27 = vrot.slane %v2370_v12, 1  ;;  %v520_v41 = vsel %vm515_vm0, %v517_v38, %v519_v23  ;;  %v1841_v38 = vld [vmem:[%s3166_s3 + $0x1b8] sm:$0xff] }
  0x33   : > { %795 = vmatpush.msrb.mxu2 %v1831_v44  ;;  %892 = vmatpush.msrb.mxu3 %v1848_v45  ;;  %v1824_v45 = vld [vmem:[%s3166_s3 + $0x130] sm:$0xff] }
  0x34   : > { %656 = vmatpush.msrb.mxu1 %v488_v47  ;;  %605 = vmatmul.f32.vlgmr.msra.gmra.mxu0 %v518_v48  ;;  %v2423_v44 = vsel %vm515_vm0, %v551_v26, %v552_v27  ;;  %v1861_v47 = vld [vmem:[%s3166_s3 + $0x258] sm:$0xff]  ;;  %v481_v48 = vld [vmem:[%s3166_s3 + $0x30] sm:$0xff] }
  0x35   : > { %796 = vmatpush.msrb.mxu2 %v1830_v49  ;;  %893 = vmatpush.msrb.mxu3 %v1847_v50  ;;  %v1823_v49 = vld [vmem:[%s3166_s3 + $0x128] sm:$0xff]  ;;  %v544_v50 = vrot.slane %v2417_v42, 1  ;;  %v1820_v26 = vld [vmem:[%s3166_s3 + $0x110] sm:$0xff] }
  0x36   : > { %657 = vmatpush.msrb.mxu1 %v487_v52  ;;  %632 = vmatmul.f32.gmra.mxu2 %v2306_v53  ;;  %v2448_v52 = vld [vmem:[%s2196_s19 + $0x20] sm:$0xff] }
  0x37   : > { %620 = vmatmul.f32.gmra.mxu1 %v2309_v54  ;;  %797 = vmatpush.msrb.mxu2 %v1829_v55  ;;  %v1840_v55 = vld [vmem:[%s3166_s3 + $0x1b0] sm:$0xff]  ;;  %v522_v5 = vrot.slane %v2448_v52, 1  ;;  %v2481_v9 = vsel %vm515_vm0, %v542_v6, %v544_v50  ;;  %v1838_v6 = vld [vmem:[%s3166_s3 + $0x1a0] sm:$0xff]  ;;  %v1835_v50 = vld [vmem:[%s3166_s3 + $0x188] sm:$0xff] }
  0x38   : > { %894 = vmatpush.msrb.mxu3 %v1846_v56  ;;  %658 = vmatpush.msrb.mxu1 %v486_v57  ;;  %v1860_v56 = vld [vmem:[%s3166_s3 + $0x250] sm:$0xff]  ;;  %v534_v57 = vrot.slane %v2429_v46, 1 }
  0x39   : > { %644 = vmatmul.f32.gmra.mxu3 %v2328_v60  ;;  %798 = vmatpush.msrb.mxu2 %v1828_v61  ;;  %v2459_v61 = vld [vmem:[%s2196_s19 + $0xb8] sm:$0x3] }
  0x3a   : > { %895 = vmatpush.msrb.mxu3 %v1845_v0  ;;  %999 = vmatpush.msrb.mxu0 %v1865_v1  ;;  %v480_v0 = vld [vmem:[%s3166_s3 + $0x28] sm:$0xff]  ;;  %v1822_v1 = vld [vmem:[%s3166_s3 + $0x120] sm:$0xff] }
  0x3b   : > { %659 = vmatpush.msrb.mxu1 %v485_v2  ;;  %799 = vmatpush.msrb.mxu2 %v1827_v3  ;;  %v1839_v2 = vld [vmem:[%s3166_s3 + $0x1a8] sm:$0xff] }
  0x3c   : > { %896 = vmatpush.msrb.mxu3 %v1844_v4  ;;  %1000 = vmatpush.msrb.mxu0 %v1864_v8  ;;  %v1859_v3 = vld [vmem:[%s3166_s3 + $0x248] sm:$0xff]  ;;  %v521_v4 = vrot.slane %v2445_v51, 1  ;;  %v479_v8 = vld [vmem:[%s3166_s3 + $0x20] sm:$0xff] }
  0x3d   : > { %660 = vmatpush.msrb.mxu1 %v484_v17  ;;  %800 = vmatpush.msrb.mxu2 %v1826_v20  ;;  %v554_v17 = vrot.slane %v2459_v61, 1  ;;  %v2487_v20 = vsel %vm515_vm0, %v532_v10, %v534_v57  ;;  %v478_v10 = vld [vmem:[%s3166_s3 + $0x18] sm:$0xff]  ;;  %v475_v57 = vld [vmem:[%s3166_s3] sm:$0xff] }
  0x3e   : > { %897 = vmatpush.msrb.mxu3 %v1843_v21  ;;  %1001 = vmatpush.msrb.mxu0 %v1863_v22  ;;  %v1821_v21 = vld [vmem:[%s3166_s3 + $0x118] sm:$0xff]  ;;  %v1858_v22 = vld [vmem:[%s3166_s3 + $0x240] sm:$0xff]  ;;  %v2503_v23 = vsel %vm515_vm0, %v521_v4, %v522_v5 }
  0x3f   : > { %661 = vmatpush.msrb.mxu1 %v483_v24  ;;  %635 = vmatmul.f32.gmra.mxu2 %v2391_v25  ;;  %v2509_v24 = vsel %vm515_vm0, %v552_v27, %v554_v17  ;;  %v477_v27 = vld [vmem:[%s3166_s3 + $0x10] sm:$0xff]  ;;  %v1913_v17 = vld [vmem:[%s3166_s3 + $0x3f8] sm:$0xff] }
  0x40   : > { %623 = vmatmul.f32.gmra.mxu1 %v2398_v32  ;;  %801 = vmatpush.msrb.mxu2 %v1825_v34  ;;  %v1837_v34 = vld [vmem:[%s3166_s3 + $0x198] sm:$0xff] }
  0x41   : > { %898 = vmatpush.msrb.mxu3 %v1842_v37  ;;  %1002 = vmatpush.msrb.mxu0 %v1862_v39  ;;  %v1857_v37 = vld [vmem:[%s3166_s3 + $0x238] sm:$0xff]  ;;  %v1819_v39 = vld [vmem:[%s3166_s3 + $0x108] sm:$0xff] }
  0x42   : > { %662 = vmatpush.msrb.mxu1 %v482_v40  ;;  %608 = vmatmul.f32.gmra.mxu0 %v520_v41  ;;  %v720_v40 = vrot.slane %v2238_v28, 2  ;;  %v721_v41 = vrot.slane %v2241_v29, 2 }
  0x43   : > { %647 = vmatmul.f32.gmra.mxu3 %v2423_v44  ;;  %802 = vmatpush.msrb.mxu2 %v1824_v45  ;;  %v2530_v45 = vld [vmem:[%s2196_s19 + $0x28] sm:$0x3] }
  0x44   : > { %899 = vmatpush.msrb.mxu3 %v1841_v38  ;;  %1003 = vmatpush.msrb.mxu0 %v1861_v47  ;;  %v1836_v38 = vld [vmem:[%s3166_s3 + $0x190] sm:$0xff] }
  0x45   : > { %663 = vmatpush.msrb.mxu1 %v481_v48  ;;  %803 = vmatpush.msrb.mxu2 %v1823_v49  ;;  %v1856_v47 = vld [vmem:[%s3166_s3 + $0x230] sm:$0xff]  ;;  %v476_v48 = vld [vmem:[%s3166_s3 + $0x8] sm:$0xff]  ;;  %v1818_v49 = vld [vmem:[%s3166_s3 + $0x100] sm:$0xff] }
  0x46   : > { %900 = vmatpush.msrb.mxu3 %v1840_v55  ;;  %1004 = vmatpush.msrb.mxu0 %v1860_v56  ;;  %v1855_v55 = vld [vmem:[%s3166_s3 + $0x228] sm:$0xff]  ;;  %v524_v56 = vrot.slane %v2530_v45, 1 }
  0x47   : > { %664 = vmatpush.msrb.mxu1 %v480_v0  ;;  %804 = vmatpush.msrb.mxu2 %v1822_v1  ;;  %v722_v0 = vsel %vm719_vm1, %v720_v40, %v721_v41  ;;  %v1834_v1 = vld [vmem:[%s3166_s3 + $0x180] sm:$0xff]  ;;  %v1929_v40 = vld [vmem:[%s3166_s3 + $0x478] sm:$0xff] }
  0x48   : > { %901 = vmatpush.msrb.mxu3 %v1839_v2  ;;  %1005 = vmatpush.msrb.mxu0 %v1859_v3  ;;  %v1854_v2 = vld [vmem:[%s3166_s3 + $0x220] sm:$0xff]  ;;  %v1897_v3 = vld [vmem:[%s3166_s3 + $0x378] sm:$0xff]  ;;  %v2566_v4 = vsel %vm515_vm0, %v522_v5, %v524_v56 }
  0x49   : > { %665 = vmatpush.msrb.mxu1 %v479_v8  ;;  %638 = vmatmul.f32.gmra.mxu2 %v2481_v9  ;;  %v1853_v8 = vld [vmem:[%s3166_s3 + $0x218] sm:$0xff] }
  0x4a   : > { %626 = vmatmul.f32.gmra.mxu1 %v2487_v20  ;;  %805 = vmatpush.msrb.mxu2 %v1821_v21  ;;  %v723_v21 = vrot.slane %v2358_v7, 2  ;;  %v1881_v5 = vld [vmem:[%s3166_s3 + $0x2f8] sm:$0xff]  ;;  %v1912_v7 = vld [vmem:[%s3166_s3 + $0x3f0] sm:$0xff] }
  0x4b   : > { %902 = vmatpush.msrb.mxu3 %v1838_v6  ;;  %1006 = vmatpush.msrb.mxu0 %v1858_v22  ;;  %v1852_v6 = vld [vmem:[%s3166_s3 + $0x210] sm:$0xff]  ;;  %v1877_v56 = vld [vmem:[%s3166_s3 + $0x2d8] sm:$0xff] }
  0x4c   : > { %666 = vmatpush.msrb.mxu1 %v478_v10  ;;  %611 = vmatmul.f32.gmra.mxu0 %v2503_v23  ;;  %v1880_v22 = vld [vmem:[%s3166_s3 + $0x2f0] sm:$0xff]  ;;  %v1895_v10 = vld [vmem:[%s3166_s3 + $0x368] sm:$0xff] }
  0x4d   : > { %650 = vmatmul.f32.gmra.mxu3 %v2509_v24  ;;  %806 = vmatpush.msrb.mxu2 %v1820_v26  ;;  %v1851_v26 = vld [vmem:[%s3166_s3 + $0x208] sm:$0xff] }
  0x4e   : > { %903 = vmatpush.msrb.mxu3 %v1837_v34  ;;  %1007 = vmatpush.msrb.mxu0 %v1857_v37  ;;  %v724_v34 = vsel %vm719_vm1, %v721_v41, %v723_v21  ;;  %v1911_v37 = vld [vmem:[%s3166_s3 + $0x3e8] sm:$0xff]  ;;  %v725_v41 = vrot.slane %v2445_v51, 2 }
  0x4f   : > { %667 = vmatpush.msrb.mxu1 %v477_v27  ;;  %807 = vmatpush.msrb.mxu2 %v1819_v39  ;;  %v1850_v27 = vld [vmem:[%s3166_s3 + $0x200] sm:$0xff]  ;;  %v1879_v39 = vld [vmem:[%s3166_s3 + $0x2e8] sm:$0xff] }
  0x50   : > { %904 = vmatpush.msrb.mxu3 %v1836_v38  ;;  %1008 = vmatpush.msrb.mxu0 %v1856_v47  ;;  %v726_v38 = vrot.slane %v2448_v52, 2  ;;  %v1894_v47 = vld [vmem:[%s3166_s3 + $0x360] sm:$0xff]  ;;  %v1891_v21 = vld [vmem:[%s3166_s3 + $0x348] sm:$0xff] }
  0x51   : > { %668 = vmatpush.msrb.mxu1 %v476_v48  ;;  %808 = vmatpush.msrb.mxu2 %v1818_v49  ;;  %v1910_v48 = vld [vmem:[%s3166_s3 + $0x3e0] sm:$0xff]  ;;  %v1928_v49 = vld [vmem:[%s3166_s3 + $0x470] sm:$0xff] }
  0x52   : > { %905 = vmatpush.msrb.mxu3 %v1835_v50  ;;  %1009 = vmatpush.msrb.mxu0 %v1855_v55  ;;  %v1893_v50 = vld [vmem:[%s3166_s3 + $0x358] sm:$0xff] }
  0x53   : > { %669 = vmatpush.msrb.mxu1 %v475_v57  ;;  %809 = vmatmul.f32.vlgmr.msrb.gmra.mxu2 %v722_v0  ;;  %v1909_v55 = vld [vmem:[%s3166_s3 + $0x3d8] sm:$0xff]  ;;  %v1927_v57 = vld [vmem:[%s3166_s3 + $0x468] sm:$0xff]  ;;  %v1892_v0 = vld [vmem:[%s3166_s3 + $0x350] sm:$0xff] }
  0x54   : > { %670 = vmatmul.f32.vlgmr.msrb.gmra.mxu1 %v2238_v28  ;;  %906 = vmatpush.msrb.mxu3 %v1834_v1  ;;  %v1896_v28 = vld [vmem:[%s3166_s3 + $0x370] sm:$0xff]  ;;  %v1926_v1 = vld [vmem:[%s3166_s3 + $0x460] sm:$0xff] }
  0x55   : > { %1010 = vmatpush.msrb.mxu0 %v1854_v2  ;;  %1202 = vmatpush.msra.mxu2 %v1897_v3  ;;  %v1908_v2 = vld [vmem:[%s3166_s3 + $0x3d0] sm:$0xff]  ;;  %v728_v3 = vrot.slane %v2530_v45, 2 }
  0x56   : > { %614 = vmatmul.f32.gmra.mxu0 %v2566_v4  ;;  %907 = vmatmul.f32.vlgmr.msrb.gmra.mxu3 %v2445_v51  ;;  %v1924_v45 = vld [vmem:[%s3166_s3 + $0x450] sm:$0xff] }
  0x57   : > { %1011 = vmatpush.msrb.mxu0 %v1853_v8  ;;  %1310 = vmatpush.msra.mxu3 %v1913_v17  ;;  %v1925_v8 = vld [vmem:[%s3166_s3 + $0x458] sm:$0xff]  ;;  %v1876_v17 = vld [vmem:[%s3166_s3 + $0x2d0] sm:$0xff] }
  0x58   : > { %1104 = vmatpush.msra.mxu1 %v1881_v5  ;;  %1203 = vmatpush.msra.mxu2 %v1896_v28  ;;  %v1875_v5 = vld [vmem:[%s3166_s3 + $0x2c8] sm:$0xff]  ;;  %v2677_v28 = vsel %vm719_vm1, %v726_v38, %v728_v3  ;;  %v741_v3 = vrot.slane %v2214_v16, 2 }
  0x59   : > { %1012 = vmatpush.msrb.mxu0 %v1852_v6  ;;  %1311 = vmatpush.msra.mxu3 %v1912_v7  ;;  %v731_v6 = vrot.slane %v2208_v14, 2  ;;  %v1890_v7 = vld [vmem:[%s3166_s3 + $0x340] sm:$0xff] }
  0x5a   : > { %1105 = vmatpush.msra.mxu1 %v1880_v22  ;;  %1204 = vmatpush.msra.mxu2 %v1895_v10  ;;  %v1906_v22 = vld [vmem:[%s3166_s3 + $0x3c0] sm:$0xff] }
  0x5b   : > { %1013 = vmatpush.msrb.mxu0 %v1851_v26  ;;  %812 = vmatmul.f32.gmra.mxu2 %v724_v34  ;;  %v1874_v10 = vld [vmem:[%s3166_s3 + $0x2c0] sm:$0xff]  ;;  %v733_v34 = vrot.slane %v2262_v36, 2  ;;  %v1873_v36 = vld [vmem:[%s3166_s3 + $0x2b8] sm:$0xff] }
  0x5c   : > { %673 = vmatmul.f32.gmra.mxu1 %v2241_v29  ;;  %1312 = vmatpush.msra.mxu3 %v1911_v37  ;;  %v1878_v29 = vld [vmem:[%s3166_s3 + $0x2e0] sm:$0xff]  ;;  %v1889_v37 = vld [vmem:[%s3166_s3 + $0x338] sm:$0xff] }
  0x5d   : > { %1014 = vmatpush.msrb.mxu0 %v1850_v27  ;;  %1106 = vmatpush.msra.mxu1 %v1879_v39  ;;  %v1905_v27 = vld [vmem:[%s3166_s3 + $0x3b8] sm:$0xff]  ;;  %v1922_v39 = vld [vmem:[%s3166_s3 + $0x440] sm:$0xff] }
  0x5e   : > { %910 = vmatmul.f32.gmra.mxu3 %v2448_v52  ;;  %1015 = vmatmul.f32.vlgmr.msrb.gmra.mxu0 %v2503_v23  ;;  %v2639_v23 = vsel %vm719_vm1, %v725_v41, %v726_v38  ;;  %v735_v41 = vrot.slane %v2334_v62, 2  ;;  %v736_v38 = vrot.slane %v2337_v63, 2 }
  0x5f   : > { %1415 = vmatpush.msra.mxu0 %v1929_v40  ;;  %1205 = vmatpush.msra.mxu2 %v1894_v47  ;;  %v2718_v40 = vsel %vm719_vm1, %v731_v6, %v733_v34  ;;  %v1888_v47 = vld [vmem:[%s3166_s3 + $0x330] sm:$0xff] }
  0x60   : > { %1313 = vmatpush.msra.mxu3 %v1910_v48  ;;  %1107 = vmatpush.msra.mxu1 %v1878_v29  ;;  %v1904_v48 = vld [vmem:[%s3166_s3 + $0x3b0] sm:$0xff]  ;;  %v1921_v29 = vld [vmem:[%s3166_s3 + $0x438] sm:$0xff] }
  0x61   : > { %1416 = vmatpush.msra.mxu0 %v1928_v49  ;;  %1206 = vmatpush.msra.mxu2 %v1893_v50  ;;  %v1872_v49 = vld [vmem:[%s3166_s3 + $0x2b0] sm:$0xff]  ;;  %v2739_v50 = vsel %vm719_vm1, %v735_v41, %v736_v38  ;;  %v1899_v41 = vld [vmem:[%s3166_s3 + $0x388] sm:$0xff] }
  0x62   : > { %1314 = vmatpush.msra.mxu3 %v1909_v55  ;;  %1108 = vmatpush.msra.mxu1 %v1877_v56  ;;  %v738_v55 = vrot.slane %v2429_v46, 2  ;;  %v1887_v56 = vld [vmem:[%s3166_s3 + $0x328] sm:$0xff]  ;;  %v1900_v34 = vld [vmem:[%s3166_s3 + $0x390] sm:$0xff] }
  0x63   : > { %815 = vmatmul.f32.gmra.mxu2 %v2639_v23  ;;  %1417 = vmatpush.msra.mxu0 %v1927_v57  ;;  %v1903_v57 = vld [vmem:[%s3166_s3 + $0x3a8] sm:$0xff] }
  0x64   : > { %676 = vmatmul.f32.gmra.mxu1 %v2445_v51  ;;  %1207 = vmatpush.msra.mxu2 %v1892_v0  ;;  %v1907_v51 = vld [vmem:[%s3166_s3 + $0x3c8] sm:$0xff]  ;;  %v1920_v0 = vld [vmem:[%s3166_s3 + $0x430] sm:$0xff] }
  0x65   : > { %1418 = vmatpush.msra.mxu0 %v1926_v1  ;;  %1315 = vmatpush.msra.mxu3 %v1908_v2  ;;  %v1871_v46 = vld [vmem:[%s3166_s3 + $0x2a8] sm:$0xff]  ;;  %v2759_v1 = vsel %vm719_vm1, %v736_v38, %v738_v55  ;;  %v740_v2 = vrot.slane %v2211_v15, 2  ;;  %v1916_v38 = vld [vmem:[%s3166_s3 + $0x410] sm:$0xff]  ;;  %v1882_v55 = vld [vmem:[%s3166_s3 + $0x300] sm:$0xff] }
  0x66   : > { %913 = vmatmul.f32.gmra.mxu3 %v2205_v13  ;;  %1018 = vmatmul.f32.gmra.mxu0 %v2566_v4  ;;  %v730_v4 = vrot.slane %v2205_v13, 2 }
  0x67   : > { %1419 = vmatpush.msra.mxu0 %v1925_v8  ;;  %1109 = vmatpush.msra.mxu1 %v1876_v17  ;;  %v1886_v8 = vld [vmem:[%s3166_s3 + $0x320] sm:$0xff] }
  0x68   : > { %1208 = vmatpush.msra.mxu2 %v1891_v21  ;;  %1316 = vmatpush.msra.mxu3 %v1907_v51  ;;  %v2698_v26 = vsel %vm719_vm1, %v730_v4, %v731_v6  ;;  %v1902_v17 = vld [vmem:[%s3166_s3 + $0x3a0] sm:$0xff]  ;;  %v1919_v21 = vld [vmem:[%s3166_s3 + $0x428] sm:$0xff]  ;;  %v1885_v4 = vld [vmem:[%s3166_s3 + $0x318] sm:$0xff] }
  0x69   : > { %1420 = vmatpush.msra.mxu0 %v1924_v45  ;;  %1110 = vmatpush.msra.mxu1 %v1875_v5  ;;  %v1870_v51 = vld [vmem:[%s3166_s3 + $0x2a0] sm:$0xff]  ;;  %v2780_v45 = vsel %vm719_vm1, %v740_v2, %v741_v3  ;;  %v743_v5 = vrot.slane %v2253_v33, 2  ;;  %v1901_v6 = vld [vmem:[%s3166_s3 + $0x398] sm:$0xff] }
  0x6a   : > { %1209 = vmatpush.msra.mxu2 %v1890_v7  ;;  %1317 = vmatpush.msra.mxu3 %v1906_v22  ;;  %v1918_v7 = vld [vmem:[%s3166_s3 + $0x420] sm:$0xff]  ;;  %v745_v22 = vrot.slane %v2321_v58, 2 }
  0x6b   : > { %818 = vmatmul.f32.gmra.mxu2 %v2677_v28  ;;  %1111 = vmatpush.msra.mxu1 %v1874_v10  ;;  %v2800_v33 = vsel %vm719_vm1, %v741_v3, %v743_v5  ;;  %v1884_v10 = vld [vmem:[%s3166_s3 + $0x310] sm:$0xff] }
  0x6c   : > { %679 = vmatmul.f32.gmra.mxu1 %v2448_v52  ;;  %v1923_v52 = vld [vmem:[%s3166_s3 + $0x448] sm:$0xff]  ;;  %1210 = vmatpush.msra.mxu2 %v1889_v37  ;;  %v1868_v37 = vld [vmem:[%s3166_s3 + $0x290] sm:$0xff] }
  0x6d   : > { %1421 = vmatpush.msra.mxu0 %v1923_v52  ;;  %1318 = vmatpush.msra.mxu3 %v1905_v27  ;;  %v746_v52 = vrot.slane %v2324_v59, 2 }
  0x6e   : > { %916 = vmatmul.f32.gmra.mxu3 %v2208_v14  ;;  %1021 = vmatmul.f32.gmra.mxu0 %v2244_v30 }
  0x6f   : > { %1422 = vmatpush.msra.mxu0 %v1922_v39  ;;  %1112 = vmatpush.msra.mxu1 %v1873_v36  ;;  %v2821_v27 = vsel %vm719_vm1, %v745_v22, %v746_v52  ;;  %v748_v39 = vrot.slane %v2417_v42, 2  ;;  %v1883_v36 = vld [vmem:[%s3166_s3 + $0x308] sm:$0xff] }
  0x70   : > { %1211 = vmatpush.msra.mxu2 %v1888_v47  ;;  %1319 = vmatpush.msra.mxu3 %v1904_v48  ;;  %v1867_v42 = vld [vmem:[%s3166_s3 + $0x288] sm:$0xff] }
  0x71   : > { %1423 = vmatpush.msra.mxu0 %v1921_v29  ;;  %1113 = vmatpush.msra.mxu1 %v1872_v49  ;;  %v2841_v47 = vsel %vm719_vm1, %v746_v52, %v748_v39  ;;  %v750_v29 = vrot.slane %v2220_v18, 2  ;;  %v751_v49 = vrot.slane %v2223_v19, 2  ;;  %v2910_v52 = vld [vmem:[%s408_s12] sm:$0xff] }
  0x72   : > { %1212 = vmatpush.msra.mxu2 %v1887_v56  ;;  %1320 = vmatpush.msra.mxu3 %v1903_v57  ;;  %v1898_v56 = vld [vmem:[%s3166_s3 + $0x380] sm:$0xff]  ;;  %v1915_v57 = vld [vmem:[%s3166_s3 + $0x408] sm:$0xff]  ;;  %v975_v39 = vrot.slane %v2910_v52, 1 }
  0x73   : > { %821 = vmatmul.f32.gmra.mxu2 %v2698_v26  ;;  %1424 = vmatpush.msra.mxu0 %v1920_v0  ;;  %v1866_v0 = vld [vmem:[%s3166_s3 + $0x280] sm:$0xff] }
  0x74   : > { %682 = vmatmul.f32.gmra.mxu1 %v2205_v13  ;;  %1213 = vmatpush.msra.mxu2 %v1886_v8 }
  0x75   : > { %1114 = vmatpush.msra.mxu1 %v1871_v46  ;;  %1321 = vmatpush.msra.mxu3 %v1902_v17  ;;  %v2868_v46 = vsel %vm719_vm1, %v750_v29, %v751_v49  ;;  %v753_v17 = vrot.slane %v2279_v43, 2  ;;  %v755_v43 = vrot.slane %v2367_v11, 2  ;;  %v2934_v29 = vld [vmem:[%s408_s12 + $0x10] sm:$0x3] }
  0x76   : > { %919 = vmatmul.f32.gmra.mxu3 %v2334_v62  ;;  %1024 = vmatmul.f32.gmra.mxu0 %v2309_v54 }
  0x77   : > { %1425 = vmatpush.msra.mxu0 %v1919_v21  ;;  %1115 = vmatpush.msra.mxu1 %v1870_v51  ;;  %v1914_v51 = vld [vmem:[%s3166_s3 + $0x400] sm:$0xff]  ;;  %v2886_v5 = vsel %vm719_vm1, %v751_v49, %v753_v17  ;;  %v978_v49 = vrot.slane %v2934_v29, 1 }
  0x78   : > { %1214 = vmatpush.msra.mxu2 %v1885_v4  ;;  %1322 = vmatpush.msra.mxu3 %v1901_v6  ;;  %v756_v6 = vrot.slane %v2370_v12, 2 }
  0x79   : > { %1426 = vmatpush.msra.mxu0 %v1918_v7 }
  0x7a   : > { %1215 = vmatpush.msra.mxu2 %v1884_v10  ;;  %1323 = vmatpush.msra.mxu3 %v1900_v34  ;;  %v2902_v22 = vsel %vm719_vm1, %v755_v43, %v756_v6  ;;  %v758_v10 = vrot.slane %v2459_v61, 2  ;;  %v2914_v34 = vld [vmem:[%s408_s12 + $0x8] sm:$0xff]  ;;  %s1800_s12 = sshll.u32 %s3181_s22, 1 }
  0x7b   : > { %824 = vmatmul.f32.gmra.mxu2 %v2718_v40  ;;  %s442_s13 = sadd.s32 %s1800_s12, %s3187_s21 }
  0x7c   : > { %685 = vmatmul.f32.gmra.mxu1 %v2208_v14  ;;  %1216 = vmatpush.msra.mxu2 %v1883_v36  ;;  %v976_v36 = vrot.slane %v2914_v34, 1 }
  0x7d   : > { %1324 = vmatpush.msra.mxu3 %v1899_v41  ;;  %v2925_v41 = vsel %vm719_vm1, %v756_v6, %v758_v10 }
  0x7e   : > { %922 = vmatmul.f32.gmra.mxu3 %v2337_v63  ;;  %1027 = vmatmul.f32.gmra.mxu0 %v2398_v32  ;;  %v2929_v61 = vsel %vm515_vm0, %v975_v39, %v976_v36 }
  0x7f   : > { %1217 = vmatpush.msra.mxu2 %v1882_v55  ;;  %1325 = vmatpush.msra.mxu3 %v1898_v56 }
  0x83   : > { %827 = vmatmul.f32.gmra.mxu2 %v2739_v50 }
  0x84   : > { %688 = vmatmul.f32.gmra.mxu1 %v2334_v62 }
  0x86   : > { %925 = vmatmul.f32.gmra.mxu3 %v2211_v15  ;;  %1030 = vmatmul.f32.gmra.mxu0 %v2487_v20 }
  0x8b   : > { %830 = vmatmul.f32.gmra.mxu2 %v2759_v1 }
  0x8c   : > { %691 = vmatmul.f32.gmra.mxu1 %v2337_v63 }
  0x8e   : > { %928 = vmatmul.f32.gmra.mxu3 %v2214_v16  ;;  %1033 = vmatmul.f32.gmra.mxu0 %v2247_v31 }
  0x93   : > { %833 = vmatmul.f32.gmra.mxu2 %v2780_v45 }
  0x94   : > { %694 = vmatmul.f32.gmra.mxu1 %v2211_v15  ;;  %v1869_v15 = vld [vmem:[%s3166_s3 + $0x298] sm:$0xff] }
  0x95   : > { %1116 = vmatpush.msra.mxu1 %v1869_v15 }
  0x96   : > { %931 = vmatmul.f32.gmra.mxu3 %v2321_v58  ;;  %1036 = vmatmul.f32.gmra.mxu0 %v2306_v53 }
  0x97   : > { %1117 = vmatpush.msra.mxu1 %v1868_v37 }
  0x99   : > { %1118 = vmatpush.msra.mxu1 %v1867_v42 }
  0x9b   : > { %836 = vmatmul.f32.gmra.mxu2 %v2800_v33  ;;  %1119 = vmatpush.msra.mxu1 %v1866_v0  ;;  %v2943_v0 = vsel %vm515_vm0, %v976_v36, %v978_v49 }
  0x9c   : > { %697 = vmatmul.f32.gmra.mxu1 %v2214_v16  ;;  %v1917_v16 = vld [vmem:[%s3166_s3 + $0x418] sm:$0xff] }
  0x9d   : > { %1427 = vmatpush.msra.mxu0 %v1917_v16 }
  0x9e   : > { %934 = vmatmul.f32.gmra.mxu3 %v2324_v59  ;;  %1039 = vmatmul.f32.gmra.mxu0 %v2391_v25 }
  0x9f   : > { %1428 = vmatpush.msra.mxu0 %v1916_v38 }
  0xa1   : > { %1429 = vmatpush.msra.mxu0 %v1915_v57 }
  0xa3   : > { %839 = vmatmul.f32.gmra.mxu2 %v2821_v27  ;;  %1430 = vmatpush.msra.mxu0 %v1914_v51 }
  0xa4   : > { %700 = vmatmul.f32.gmra.mxu1 %v2321_v58 }
  0xa6   : > { %937 = vmatmul.f32.gmra.mxu3 %v2220_v18  ;;  %1042 = vmatmul.f32.gmra.mxu0 %v2481_v9 }
  0xab   : > { %842 = vmatmul.f32.gmra.mxu2 %v2841_v47  ;;  %v2844_v48 = vpop.f32.mrf.mxu1 }
  0xac   : > { %703 = vmatmul.f32.gmra.mxu1 %v2324_v59 }
  0xae   : > { %940 = vmatmul.f32.gmra.mxu3 %v2223_v19  ;;  %1045 = vmatmul.f32.gmra.mxu0 %v2259_v35 }
  0xb1   : > { %v2870_v2 = vpop.f32.mrf.mxu2  ;;  %v606_v21 = vpop.f32.mrf.mxu0 }
  0xb3   : > { %845 = vmatmul.f32.gmra.mxu2 %v2868_v46  ;;  %v2874_v3 = vpop.f32.mrf.mxu3 }
  0xb4   : > { %706 = vmatmul.f32.gmra.mxu1 %v2220_v18  ;;  %v2877_v8 = vpop.f32.mrf.mxu1 }
  0xb6   : > { %943 = vmatmul.f32.gmra.mxu3 %v2367_v11  ;;  %1048 = vmatmul.f32.gmra.mxu0 %v2328_v60 }
  0xb9   : > { %v2888_v4 = vpop.f32.mrf.mxu2 }
  0xbb   : > { %848 = vmatmul.f32.gmra.mxu2 %v2886_v5 }
  0xbc   : > { %709 = vmatmul.f32.gmra.mxu1 %v2223_v19  ;;  %v2893_v18 = vpop.f32.mrf.mxu3 }
  0xbd   : > { %v2897_v7 = vpop.f32.mrf.mxu1 }
  0xbe   : > { %946 = vmatmul.f32.gmra.mxu3 %v2370_v12  ;;  %1051 = vmatmul.f32.gmra.mxu0 %v2423_v44 }
  0xbf   : > { %v609_v15 = vpop.f32.mrf.mxu0 }
  0xc2   : > { %v2907_v19 = vpop.f32.mrf.mxu2 }
  0xc3   : > { %851 = vmatmul.f32.gmra.mxu2 %v2902_v22 }
  0xc4   : > { %712 = vmatmul.f32.gmra.mxu1 %v2367_v11 }
  0xc6   : > { %949 = vmatmul.f32.gmra.mxu3 %v2910_v52  ;;  %1054 = vmatmul.f32.gmra.mxu0 %v2509_v24  ;;  %v2918_v16 = vpop.f32.mrf.mxu3 }
  0xc7   : > { %v2920_v37 = vpop.f32.mrf.mxu1 }
  0xc9   : > { %v612_v38 = vpop.f32.mrf.mxu0 }
  0xcb   : > { %854 = vmatmul.f32.gmra.mxu2 %v2925_v41 }
  0xcc   : > { %715 = vmatmul.f32.gmra.mxu1 %v2370_v12  ;;  %v2932_v42 = vpop.f32.mrf.mxu2 }
  0xce   : > { %952 = vmatmul.f32.gmra.mxu3 %v2914_v34  ;;  %1057 = vmatmul.f32.gmra.mxu0 %v2929_v61 }
  0xd0   : > { %v2939_v55 = vpop.f32.mrf.mxu3 }
  0xd1   : > { %v671_v56 = vpop.f32.mrf.mxu1 }
  0xd2   : > { %v672_v12 = vadd.f32 %v671_v56, %v606_v21 }
  0xd3   : > { %v615_v57 = vpop.f32.mrf.mxu0  ;;  %1218 = vmatmul.f32.vlgmr.msra.gmra.mxu2 %v2205_v13 }
  0xd4   : > { %1120 = vmatmul.f32.vlgmr.msra.gmra.mxu1 %v2639_v23 }
  0xd6   : > { %1060 = vmatmul.f32.gmra.mxu0 %v2943_v0  ;;  %1326 = vmatmul.f32.vlgmr.msra.gmra.mxu3 %v2244_v30  ;;  %v810_v17 = vpop.f32.mrf.mxu2 }
  0xd7   : > { %v858_v51 = vadd.f32 %v810_v17, %v672_v12 }
  0xd9   : > { %v674_v43 = vpop.f32.mrf.mxu1  ;;  %v908_v6 = vpop.f32.mrf.mxu3 }
  0xda   : > { %v2948_v10 = vadd.f32 %v908_v6, %v858_v51  ;;  %v675_v13 = vadd.f32 %v674_v43, %v609_v15 }
  0xdb   : > { %v2950_v39 = vpop.f32.mrf.mxu0  ;;  %1221 = vmatmul.f32.gmra.mxu2 %v2208_v14 }
  0xdc   : > { %1123 = vmatmul.f32.gmra.mxu1 %v2677_v28 }
  0xde   : > { %1329 = vmatmul.f32.gmra.mxu3 %v2309_v54  ;;  %1431 = vmatmul.f32.vlgmr.msra.gmra.mxu0 %v2698_v26  ;;  %v813_v23 = vpop.f32.mrf.mxu2 }
  0xdf   : > { %v859_v21 = vadd.f32 %v813_v23, %v675_v13  ;;  %v2037_v23 = vld [vmem:[%s2196_s19 + $0x60] sm:$0xff] }
  0xe1   : > { %v677_v30 = vpop.f32.mrf.mxu1  ;;  %v911_v36 = vpop.f32.mrf.mxu3 }
  0xe2   : > { %v2956_v49 = vadd.f32 %v911_v36, %v859_v21  ;;  %v678_v14 = vadd.f32 %v677_v30, %v612_v38 }
  0xe3   : > { %v2958_v56 = vpop.f32.mrf.mxu0  ;;  %1224 = vmatmul.f32.gmra.mxu2 %v2334_v62 }
  0xe4   : > { %1126 = vmatmul.f32.gmra.mxu1 %v2698_v26 }
  0xe6   : > { %1332 = vmatmul.f32.gmra.mxu3 %v2398_v32  ;;  %1434 = vmatmul.f32.gmra.mxu0 %v2718_v40  ;;  %v816_v54 = vpop.f32.mrf.mxu2 }
  0xe7   : > { %v860_v28 = vadd.f32 %v816_v54, %v678_v14  ;;  %v2038_v14 = vld [vmem:[%s2196_s19 + $0x68] sm:$0xff] }
  0xe9   : > { %v680_v15 = vpop.f32.mrf.mxu1  ;;  %v914_v12 = vpop.f32.mrf.mxu3 }
  0xea   : > { %v2964_v17 = vadd.f32 %v914_v12, %v860_v28  ;;  %v681_v62 = vadd.f32 %v680_v15, %v615_v57 }
  0xeb   : > { %v2966_v51 = vpop.f32.mrf.mxu0  ;;  %1227 = vmatmul.f32.gmra.mxu2 %v2337_v63 }
  0xec   : > { %1129 = vmatmul.f32.gmra.mxu1 %v2718_v40 }
  0xee   : > { %1335 = vmatmul.f32.gmra.mxu3 %v2487_v20  ;;  %1437 = vmatmul.f32.gmra.mxu0 %v2739_v50  ;;  %v819_v32 = vpop.f32.mrf.mxu2 }
  0xef   : > { %v861_v26 = vadd.f32 %v819_v32, %v681_v62 }
  0xf1   : > { %v683_v38 = vpop.f32.mrf.mxu1  ;;  %v917_v43 = vpop.f32.mrf.mxu3 }
  0xf2   : > { %v2972_v6 = vadd.f32 %v917_v43, %v861_v26  ;;  %v684_v63 = vadd.f32 %v683_v38, %v2844_v48 }
  0xf3   : > { %v2974_v13 = vpop.f32.mrf.mxu0  ;;  %1230 = vmatmul.f32.gmra.mxu2 %v2037_v23 }
  0xf4   : > { %1132 = vmatmul.f32.gmra.mxu1 %v2739_v50 }
  0xf6   : > { %1338 = vmatmul.f32.gmra.mxu3 %v2247_v31  ;;  %1440 = vmatmul.f32.gmra.mxu0 %v2759_v1  ;;  %v822_v20 = vpop.f32.mrf.mxu2 }
  0xf7   : > { %v862_v40 = vadd.f32 %v822_v20, %v684_v63  ;;  %v2039_v20 = vld [vmem:[%s2196_s19 + $0x90] sm:$0xff] }
  0xf9   : > { %v686_v57 = vpop.f32.mrf.mxu1  ;;  %v920_v21 = vpop.f32.mrf.mxu3 }
  0xfa   : > { %v2981_v30 = vadd.f32 %v920_v21, %v862_v40  ;;  %v687_v50 = vadd.f32 %v686_v57, %v2877_v8 }
  0xfb   : > { %v2983_v36 = vpop.f32.mrf.mxu0  ;;  %1233 = vmatmul.f32.gmra.mxu2 %v2038_v14  ;;  %v2040_v14 = vld [vmem:[%s2196_s19 + $0x98] sm:$0xff] }
  0xfc   : > { %1135 = vmatmul.f32.gmra.mxu1 %v2759_v1 }
  0xfe   : > { %1341 = vmatmul.f32.gmra.mxu3 %v2306_v53  ;;  %1443 = vmatmul.f32.gmra.mxu0 %v2780_v45  ;;  %v825_v31 = vpop.f32.mrf.mxu2 }
  0xff   : > { %v863_v48 = vadd.f32 %v825_v31, %v687_v50 }
 0x101   : > { %v689_v54 = vpop.f32.mrf.mxu1  ;;  %v923_v28 = vpop.f32.mrf.mxu3 }
 0x102   : > { %v2990_v15 = vadd.f32 %v923_v28, %v863_v48  ;;  %v690_v1 = vadd.f32 %v689_v54, %v2897_v7 }
 0x103   : > { %v2992_v12 = vpop.f32.mrf.mxu0  ;;  %1236 = vmatmul.f32.gmra.mxu2 %v2321_v58 }
 0x104   : > { %1138 = vmatmul.f32.gmra.mxu1 %v2780_v45 }
 0x106   : > { %1344 = vmatmul.f32.gmra.mxu3 %v2391_v25  ;;  %1446 = vmatmul.f32.gmra.mxu0 %v2800_v33  ;;  %v828_v53 = vpop.f32.mrf.mxu2 }
 0x107   : > { %v864_v8 = vadd.f32 %v828_v53, %v690_v1 }
 0x109   : > { %v692_v62 = vpop.f32.mrf.mxu1  ;;  %v926_v32 = vpop.f32.mrf.mxu3 }
 0x10a   : > { %v2999_v26 = vadd.f32 %v926_v32, %v864_v8  ;;  %v693_v58 = vadd.f32 %v692_v62, %v2920_v37 }
 0x10b   : > { %v3001_v38 = vpop.f32.mrf.mxu0  ;;  %1239 = vmatmul.f32.gmra.mxu2 %v2324_v59 }
 0x10c   : > { %1141 = vmatmul.f32.gmra.mxu1 %v2800_v33 }
 0x10e   : > { %1347 = vmatmul.f32.gmra.mxu3 %v2481_v9  ;;  %1449 = vmatmul.f32.gmra.mxu0 %v2821_v27  ;;  %v831_v25 = vpop.f32.mrf.mxu2 }
 0x10f   : > { %v865_v45 = vadd.f32 %v831_v25, %v693_v58  ;;  %v2041_v58 = vld [vmem:[%s2196_s19 + $0xb0] sm:$0xff]  ;;  %s420_s19 = sadd.s32 %s1995_s7, %s2172_s16  ;;  %s1801_s7 = sshll.u32 %s442_s13, 1 }
 0x110   : > { %s1795_s14 = sshll.u32 %s420_s19, 3  ;;  %s444_s16 = scalar_lea.vmem %s3169_s6, %s1801_s7 }
 0x111   : > { %v695_v7 = vpop.f32.mrf.mxu1  ;;  %v929_v43 = vpop.f32.mrf.mxu3  ;;  %s422_s17 = scalar_lea.vmem %s3165_s2, %s1795_s14 }
 0x112   : > { %v3008_v23 = vadd.f32 %v929_v43, %v865_v45  ;;  %v696_v59 = vadd.f32 %v695_v7, %v2870_v2 }
 0x113   : > { %v3010_v63 = vpop.f32.mrf.mxu0  ;;  %1242 = vmatmul.f32.gmra.mxu2 %v2039_v20 }
 0x114   : > { %1144 = vmatmul.f32.gmra.mxu1 %v2821_v27 }
 0x116   : > { %1350 = vmatmul.f32.gmra.mxu3 %v2259_v35  ;;  %1452 = vmatmul.f32.gmra.mxu0 %v2841_v47  ;;  %v834_v9 = vpop.f32.mrf.mxu2 }
 0x117   : > { %v866_v33 = vadd.f32 %v834_v9, %v696_v59  ;;  %v1080_v59 = vrot.slane %v2910_v52, 2  ;;  %v1081_v9 = vrot.slane %v2914_v34, 2 }
 0x119   : > { %v698_v37 = vpop.f32.mrf.mxu1  ;;  %v932_v40 = vpop.f32.mrf.mxu3 }
 0x11a   : > { %v964_v57 = vadd.f32 %v932_v40, %v866_v33  ;;  %v699_v27 = vadd.f32 %v698_v37, %v2888_v4 }
 0x11b   : > { %v1040_v21 = vpop.f32.mrf.mxu0  ;;  %1245 = vmatmul.f32.gmra.mxu2 %v2040_v14 }
 0x11c   : > { %v3018_v50 = vadd.f32 %v1040_v21, %v964_v57  ;;  %1147 = vmatmul.f32.gmra.mxu1 %v2841_v47  ;;  %v472_v57 = vld [vmem:[%s422_s17] sm:$0xff] }
 0x11e   : > { %1353 = vmatmul.f32.gmra.mxu3 %v2328_v60  ;;  %1455 = vmatmul.f32.gmra.mxu0 %v2868_v46  ;;  %v837_v35 = vpop.f32.mrf.mxu2 }
 0x11f   : > { %v867_v2 = vadd.f32 %v837_v35, %v699_v27  ;;  %v1286_v35 = vrot.slane %v472_v57, 1 }
 0x121   : > { %v701_v31 = vpop.f32.mrf.mxu1  ;;  %v935_v48 = vpop.f32.mrf.mxu3 }
 0x122   : > { %v965_v54 = vadd.f32 %v935_v48, %v867_v2  ;;  %v702_v47 = vadd.f32 %v701_v31, %v2907_v19  ;;  %v1083_v31 = vrot.slane %v2934_v29, 2  ;;  %v1391_v29 = vrot.slane %v472_v57, 2 }
 0x123   : > { %v1043_v28 = vpop.f32.mrf.mxu0  ;;  %1248 = vmatmul.f32.gmra.mxu2 %v2367_v11 }
 0x124   : > { %v3025_v1 = vadd.f32 %v1043_v28, %v965_v54  ;;  %1150 = vmatmul.f32.gmra.mxu1 %v2868_v46 }
 0x126   : > { %1356 = vmatmul.f32.gmra.mxu3 %v2423_v44  ;;  %1458 = vmatmul.f32.gmra.mxu0 %v2886_v5  ;;  %v840_v60 = vpop.f32.mrf.mxu2 }
 0x127   : > { %v868_v4 = vadd.f32 %v840_v60, %v702_v47  ;;  %v1084_v47 = vsel %vm719_vm1, %v1081_v9, %v1083_v31 }
 0x129   : > { %v704_v53 = vpop.f32.mrf.mxu1  ;;  %v938_v8 = vpop.f32.mrf.mxu3 }
 0x12a   : > { %v966_v62 = vadd.f32 %v938_v8, %v868_v4  ;;  %v705_v46 = vadd.f32 %v704_v53, %v2932_v42 }
 0x12b   : > { %v1046_v32 = vpop.f32.mrf.mxu0  ;;  %1251 = vmatmul.f32.gmra.mxu2 %v2041_v58 }
 0x12c   : > { %v3033_v11 = vadd.f32 %v1046_v32, %v966_v62  ;;  %1153 = vmatmul.f32.gmra.mxu1 %v2886_v5 }
 0x12e   : > { %1359 = vmatmul.f32.gmra.mxu3 %v2509_v24  ;;  %1461 = vmatmul.f32.gmra.mxu0 %v2902_v22  ;;  %v843_v44 = vpop.f32.mrf.mxu2 }
 0x12f   : > { %v869_v19 = vadd.f32 %v843_v44, %v705_v46 }
 0x131   : > { %v707_v25 = vpop.f32.mrf.mxu1  ;;  %v941_v45 = vpop.f32.mrf.mxu3 }
 0x132   : > { %v967_v7 = vadd.f32 %v941_v45, %v869_v19  ;;  %v708_v5 = vadd.f32 %v707_v25, %v2874_v3  ;;  %v1082_v3 = vsel %vm719_vm1, %v1080_v59, %v1081_v9  ;;  %v1064_v9 = vadd.f32 %v2950_v39, %v2948_v10  ;;  %v3081_v10 = vld [vmem:[%s3167_s4] ss:$0 sm:$0xff] }
 0x133   : > { %v1049_v43 = vpop.f32.mrf.mxu0  ;;  %1254 = vmatmul.f32.gmra.mxu2 %v2910_v52  ;;  %v473_v52 = vld [vmem:[%s422_s17 + $0x8] sm:$0xff]  ;;  %v1065_v39 = vadd.f32 %v2958_v56, %v2956_v49  ;;  %v1066_v49 = vadd.f32 %v2966_v51, %v2964_v17 }
 0x134   : > { %v3041_v20 = vadd.f32 %v1049_v43, %v967_v7  ;;  %1156 = vmatmul.f32.gmra.mxu1 %v2902_v22  ;;  %v1287_v2 = vrot.slane %v473_v52, 1  ;;  %v1392_v62 = vrot.slane %v473_v52, 2 }
 0x136   : > { %1362 = vmatmul.f32.gmra.mxu3 %v2929_v61  ;;  %1464 = vmatmul.f32.gmra.mxu0 %v2925_v41  ;;  %v846_v24 = vpop.f32.mrf.mxu2  ;;  %v1393_v25 = vsel %vm719_vm1, %v1391_v29, %v1392_v62 }
 0x137   : > { %v870_v42 = vadd.f32 %v846_v24, %v708_v5 }
 0x139   : > { %v710_v33 = vpop.f32.mrf.mxu1  ;;  %v944_v37 = vpop.f32.mrf.mxu3 }
 0x13a   : > { %v968_v22 = vadd.f32 %v944_v37, %v870_v42  ;;  %v711_v21 = vadd.f32 %v710_v33, %v2893_v18  ;;  %v474_v18 = vld [vmem:[%s422_s17 + $0x10] sm:$0x3] }
 0x13b   : > { %v1052_v40 = vpop.f32.mrf.mxu0  ;;  %1257 = vmatmul.f32.gmra.mxu2 %v2914_v34  ;;  %v1289_v8 = vrot.slane %v474_v18, 1  ;;  %v1394_v5 = vrot.slane %v474_v18, 2 }
 0x13c   : > { %v3054_v61 = vadd.f32 %v1052_v40, %v968_v22  ;;  %1159 = vmatmul.f32.gmra.mxu1 %v2925_v41  ;;  %v1288_v41 = vsel %vm515_vm0, %v1286_v35, %v1287_v2 }
 0x13d   : > { %v1290_v19 = vsel %vm515_vm0, %v1287_v2, %v1289_v8  ;;  %v1395_v37 = vsel %vm719_vm1, %v1392_v62, %v1394_v5 }
 0x13e   : > { %1365 = vmatmul.f32.gmra.mxu3 %v2943_v0  ;;  %1467 = vmatmul.f32.gmra.mxu0 %v1082_v3  ;;  %v849_v14 = vpop.f32.mrf.mxu2 }
 0x13f   : > { %v871_v27 = vadd.f32 %v849_v14, %v711_v21 }
 0x141   : > { %v713_v34 = vpop.f32.mrf.mxu1  ;;  %v947_v48 = vpop.f32.mrf.mxu3 }
 0x142   : > { %v969_v54 = vadd.f32 %v947_v48, %v871_v27  ;;  %v714_v0 = vadd.f32 %v713_v34, %v2918_v16 }
 0x143   : > { %v1055_v28 = vpop.f32.mrf.mxu0  ;;  %1260 = vmatmul.f32.gmra.mxu2 %v472_v57 }
 0x144   : > { %v3062_v60 = vadd.f32 %v1055_v28, %v969_v54  ;;  %1162 = vmatmul.f32.gmra.mxu1 %v1082_v3 }
 0x146   : > { %1368 = vmatmul.f32.gmra.mxu3 %v1288_v41  ;;  %1470 = vmatmul.f32.gmra.mxu0 %v1084_v47  ;;  %v852_v4 = vpop.f32.mrf.mxu2 }
 0x147   : > { %v872_v53 = vadd.f32 %v852_v4, %v714_v0 }
 0x149   : > { %v716_v32 = vpop.f32.mrf.mxu1  ;;  %v950_v58 = vpop.f32.mrf.mxu3 }
 0x14a   : > { %v970_v46 = vadd.f32 %v950_v58, %v872_v53  ;;  %v717_v16 = vadd.f32 %v716_v32, %v2939_v55 }
 0x14b   : > { %v1058_v44 = vpop.f32.mrf.mxu0  ;;  %1263 = vmatmul.f32.gmra.mxu2 %v473_v52 }
 0x14c   : > { %v3067_v45 = vadd.f32 %v1058_v44, %v970_v46  ;;  %1165 = vmatmul.f32.gmra.mxu1 %v1084_v47  ;;  %v1067_v44 = vadd.f32 %v2974_v13, %v2972_v6 }
 0x14e   : > { %1371 = vmatmul.f32.gmra.mxu3 %v1290_v19  ;;  %1473 = vmatmul.f32.gmra.mxu0 %v1393_v25  ;;  %v855_v7 = vpop.f32.mrf.mxu2 }
 0x14f   : > { %v873_v43 = vadd.f32 %v855_v7, %v717_v16 }
 0x151   : > { %v953_v24 = vpop.f32.mrf.mxu3  ;;  %v1121_v42 = vpop.f32.mrf.mxu1 }
 0x152   : > { %v971_v59 = vadd.f32 %v953_v24, %v873_v43  ;;  %v1169_v55 = vadd.f32 %v1121_v42, %v1064_v9 }
 0x153   : > { %v1061_v33 = vpop.f32.mrf.mxu0 }
 0x154   : > { %v3075_v22 = vadd.f32 %v1061_v33, %v971_v59  ;;  %v1068_v33 = vadd.f32 %v2983_v36, %v2981_v30 }
 0x156   : > { %1476 = vmatmul.f32.gmra.mxu0 %v1395_v37  ;;  %v1219_v40 = vpop.f32.mrf.mxu2 }
 0x157   : > { %v1267_v3 = vadd.f32 %v1219_v40, %v1169_v55 }
 0x159   : > { %v1124_v57 = vpop.f32.mrf.mxu1  ;;  %v1327_v52 = vpop.f32.mrf.mxu3 }
 0x15a   : > { %v1375_v21 = vadd.f32 %v1327_v52, %v1267_v3  ;;  %v1170_v35 = vadd.f32 %v1124_v57, %v1065_v39 }
 0x15b   : > { %v1432_v14 = vpop.f32.mrf.mxu0 }
 0x15c   : > { %v1480_v27 = vadd.f32 %v1432_v14, %v1375_v21 }
 0x15e   : > { %v1500_v2 = vadd.f32 %v3081_v10, %v1480_v27  ;;  %v1222_v31 = vpop.f32.mrf.mxu2 }
 0x15f   : > { %v1268_v34 = vadd.f32 %v1222_v31, %v1170_v35  ;;  %v1069_v35 = vadd.f32 %v2992_v12, %v2990_v15 }
 0x160   : > { %1516 = vst [vmem:[%s3088_s11] sm:$0xff] %v1500_v2  ;;  %v1553_v29 = vmul.f32 %v1500_v2, %v1500_v2 }
 0x161   : > { %v1127_v48 = vpop.f32.mrf.mxu1  ;;  %v1330_v54 = vpop.f32.mrf.mxu3 }
 0x162   : > { %v1376_v28 = vadd.f32 %v1330_v54, %v1268_v34  ;;  %v1171_v47 = vadd.f32 %v1127_v48, %v1066_v49 }
 0x163   : > { %v1435_v56 = vpop.f32.mrf.mxu0 }
 0x164   : > { %v1481_v41 = vadd.f32 %v1435_v56, %v1376_v28 }
 0x166   : > { %v1501_v18 = vadd.f32 %v3081_v10, %v1481_v41  ;;  %v1225_v0 = vpop.f32.mrf.mxu2 }
 0x167   : > { %v1269_v4 = vadd.f32 %v1225_v0, %v1171_v47 }
 0x168   : > { %1517 = vst [vmem:[%s3088_s11 + $0x8] sm:$0xff] %v1501_v18  ;;  %v1532_v53 = vadd.f32 %v1501_v18, %v1500_v2  ;;  %v1554_v8 = vmul.f32 %v1501_v18, %v1501_v18  ;;  %v1070_v18 = vadd.f32 %v3001_v38, %v2999_v26 }
 0x169   : > { %v1130_v62 = vpop.f32.mrf.mxu1  ;;  %v1333_v32 = vpop.f32.mrf.mxu3 }
 0x16a   : > { %v1569_v58 = vadd.f32 %v1554_v8, %v1553_v29  ;;  %v1377_v46 = vadd.f32 %v1333_v32, %v1269_v4  ;;  %v1172_v19 = vadd.f32 %v1130_v62, %v1067_v44 }
 0x16b   : > { %v1438_v17 = vpop.f32.mrf.mxu0 }
 0x16c   : > { %v1482_v51 = vadd.f32 %v1438_v17, %v1377_v46  ;;  %v1071_v17 = vadd.f32 %v3010_v63, %v3008_v23 }
 0x16e   : > { %v1502_v25 = vadd.f32 %v3081_v10, %v1482_v51  ;;  %v1228_v16 = vpop.f32.mrf.mxu2 }
 0x16f   : > { %v1270_v7 = vadd.f32 %v1228_v16, %v1172_v19 }
 0x170   : > { %1518 = vst [vmem:[%s3088_s11 + $0x10] sm:$0xff] %v1502_v25  ;;  %v1533_v43 = vadd.f32 %v1532_v53, %v1502_v25  ;;  %v1555_v5 = vmul.f32 %v1502_v25, %v1502_v25 }
 0x171   : > { %v1133_v24 = vpop.f32.mrf.mxu1  ;;  %v1336_v42 = vpop.f32.mrf.mxu3 }
 0x172   : > { %v1570_v59 = vadd.f32 %v1569_v58, %v1555_v5  ;;  %v1378_v9 = vadd.f32 %v1336_v42, %v1270_v7  ;;  %v1173_v13 = vadd.f32 %v1133_v24, %v1068_v33 }
 0x173   : > { %v1441_v37 = vpop.f32.mrf.mxu0 }
 0x174   : > { %v1483_v6 = vadd.f32 %v1441_v37, %v1378_v9 }
 0x176   : > { %v1503_v55 = vadd.f32 %v3081_v10, %v1483_v6  ;;  %v1231_v40 = vpop.f32.mrf.mxu2 }
 0x177   : > { %v1271_v3 = vadd.f32 %v1231_v40, %v1173_v13 }
 0x178   : > { %1519 = vst [vmem:[%s3088_s11 + $0x18] sm:$0xff] %v1503_v55  ;;  %v1534_v57 = vadd.f32 %v1533_v43, %v1503_v55  ;;  %v1556_v52 = vmul.f32 %v1503_v55, %v1503_v55 }
 0x179   : > { %v1136_v21 = vpop.f32.mrf.mxu1  ;;  %v1339_v39 = vpop.f32.mrf.mxu3 }
 0x17a   : > { %v1571_v14 = vadd.f32 %v1570_v59, %v1556_v52  ;;  %v1379_v27 = vadd.f32 %v1339_v39, %v1271_v3  ;;  %v1174_v36 = vadd.f32 %v1136_v21, %v1069_v35 }
 0x17b   : > { %v1444_v2 = vpop.f32.mrf.mxu0 }
 0x17c   : > { %v1484_v30 = vadd.f32 %v1444_v2, %v1379_v27 }
 0x17e   : > { %v1504_v31 = vadd.f32 %v3081_v10, %v1484_v30  ;;  %v1234_v34 = vpop.f32.mrf.mxu2 }
 0x17f   : > { %v1272_v48 = vadd.f32 %v1234_v34, %v1174_v36 }
 0x180   : > { %1520 = vst [vmem:[%s3088_s11 + $0x20] sm:$0xff] %v1504_v31  ;;  %v1535_v54 = vadd.f32 %v1534_v57, %v1504_v31  ;;  %v1557_v28 = vmul.f32 %v1504_v31, %v1504_v31 }
 0x181   : > { %v1139_v49 = vpop.f32.mrf.mxu1  ;;  %v1342_v56 = vpop.f32.mrf.mxu3 }
 0x182   : > { %v1572_v41 = vadd.f32 %v1571_v14, %v1557_v28  ;;  %v1380_v47 = vadd.f32 %v1342_v56, %v1272_v48  ;;  %v1175_v12 = vadd.f32 %v1139_v49, %v1070_v18 }
 0x183   : > { %v1447_v0 = vpop.f32.mrf.mxu0 }
 0x184   : > { %v1485_v15 = vadd.f32 %v1447_v0, %v1380_v47 }
 0x186   : > { %v1505_v4 = vadd.f32 %v3081_v10, %v1485_v15  ;;  %v1237_v29 = vpop.f32.mrf.mxu2 }
 0x187   : > { %v1273_v53 = vadd.f32 %v1237_v29, %v1175_v12 }
 0x188   : > { %1521 = vst [vmem:[%s3088_s11 + $0x28] sm:$0xff] %v1505_v4  ;;  %v1536_v8 = vadd.f32 %v1535_v54, %v1505_v4  ;;  %v1558_v62 = vmul.f32 %v1505_v4, %v1505_v4 }
 0x189   : > { %v1142_v32 = vpop.f32.mrf.mxu1  ;;  %v1345_v58 = vpop.f32.mrf.mxu3 }
 0x18a   : > { %v1573_v46 = vadd.f32 %v1572_v41, %v1558_v62  ;;  %v1381_v44 = vadd.f32 %v1345_v58, %v1273_v53  ;;  %v1176_v38 = vadd.f32 %v1142_v32, %v1071_v17 }
 0x18b   : > { %v1450_v51 = vpop.f32.mrf.mxu0 }
 0x18c   : > { %v1486_v26 = vadd.f32 %v1450_v51, %v1381_v44 }
 0x18e   : > { %v1506_v19 = vadd.f32 %v3081_v10, %v1486_v26  ;;  %v1240_v25 = vpop.f32.mrf.mxu2 }
 0x18f   : > { %v1274_v16 = vadd.f32 %v1240_v25, %v1176_v38 }
 0x190   : > { %1522 = vst [vmem:[%s3088_s11 + $0x30] sm:$0xff] %v1506_v19  ;;  %v1537_v7 = vadd.f32 %v1536_v8, %v1506_v19  ;;  %v1559_v43 = vmul.f32 %v1506_v19, %v1506_v19 }
 0x191   : > { %v1145_v5 = vpop.f32.mrf.mxu1  ;;  %v1348_v24 = vpop.f32.mrf.mxu3 }
 0x192   : > { %v1574_v42 = vadd.f32 %v1573_v46, %v1559_v43  ;;  %v1382_v59 = vadd.f32 %v1348_v24, %v1274_v16  ;;  %v1177_v37 = vadd.f32 %v1145_v5, %v3018_v50 }
 0x193   : > { %v1453_v9 = vpop.f32.mrf.mxu0 }
 0x194   : > { %v1487_v33 = vadd.f32 %v1453_v9, %v1382_v59 }
 0x196   : > { %v1507_v23 = vadd.f32 %v3081_v10, %v1487_v33  ;;  %v1243_v63 = vpop.f32.mrf.mxu2 }
 0x197   : > { %v1275_v6 = vadd.f32 %v1243_v63, %v1177_v37 }
 0x198   : > { %1523 = vst [vmem:[%s3088_s11 + $0x38] sm:$0xff] %v1507_v23  ;;  %v1538_v13 = vadd.f32 %v1537_v7, %v1507_v23  ;;  %v1560_v55 = vmul.f32 %v1507_v23, %v1507_v23 }
 0x199   : > { %v1148_v40 = vpop.f32.mrf.mxu1  ;;  %v1351_v3 = vpop.f32.mrf.mxu3 }
 0x19a   : > { %v1575_v57 = vadd.f32 %v1574_v42, %v1560_v55  ;;  %v1383_v52 = vadd.f32 %v1351_v3, %v1275_v6  ;;  %v1178_v14 = vadd.f32 %v1148_v40, %v3025_v1 }
 0x19b   : > { %v1456_v21 = vpop.f32.mrf.mxu0 }
 0x19c   : > { %v1488_v39 = vadd.f32 %v1456_v21, %v1383_v52 }
 0x19e   : > { %v1508_v27 = vadd.f32 %v3081_v10, %v1488_v39  ;;  %v1246_v50 = vpop.f32.mrf.mxu2 }
 0x19f   : > { %v1276_v35 = vadd.f32 %v1246_v50, %v1178_v14 }
 0x1a0   : > { %1524 = vst [vmem:[%s3088_s11 + $0x40] sm:$0xff] %v1508_v27  ;;  %v1539_v2 = vadd.f32 %v1538_v13, %v1508_v27  ;;  %v1561_v30 = vmul.f32 %v1508_v27, %v1508_v27 }
 0x1a1   : > { %v1151_v36 = vpop.f32.mrf.mxu1  ;;  %v1354_v31 = vpop.f32.mrf.mxu3 }
 0x1a2   : > { %v1576_v34 = vadd.f32 %v1575_v57, %v1561_v30  ;;  %v1384_v48 = vadd.f32 %v1354_v31, %v1276_v35  ;;  %v1179_v49 = vadd.f32 %v1151_v36, %v3033_v11 }
 0x1a3   : > { %v1459_v54 = vpop.f32.mrf.mxu0 }
 0x1a4   : > { %v1489_v28 = vadd.f32 %v1459_v54, %v1384_v48 }
 0x1a6   : > { %v1509_v56 = vadd.f32 %v3081_v10, %v1489_v28  ;;  %v1249_v1 = vpop.f32.mrf.mxu2 }
 0x1a7   : > { %v1277_v41 = vadd.f32 %v1249_v1, %v1179_v49 }
 0x1a8   : > { %1525 = vst [vmem:[%s3088_s11 + $0x48] sm:$0xff] %v1509_v56  ;;  %v1540_v47 = vadd.f32 %v1539_v2, %v1509_v56  ;;  %v1562_v18 = vmul.f32 %v1509_v56, %v1509_v56 }
 0x1a9   : > { %v1154_v0 = vpop.f32.mrf.mxu1  ;;  %v1357_v15 = vpop.f32.mrf.mxu3 }
 0x1aa   : > { %v1577_v12 = vadd.f32 %v1576_v34, %v1562_v18  ;;  %v1385_v4 = vadd.f32 %v1357_v15, %v1277_v41  ;;  %v1180_v8 = vadd.f32 %v1154_v0, %v3041_v20 }
 0x1ab   : > { %v1462_v29 = vpop.f32.mrf.mxu0 }
 0x1ac   : > { %v1490_v53 = vadd.f32 %v1462_v29, %v1385_v4 }
 0x1ae   : > { %v1510_v62 = vadd.f32 %v3081_v10, %v1490_v53  ;;  %v1252_v11 = vpop.f32.mrf.mxu2 }
 0x1af   : > { %v1278_v32 = vadd.f32 %v1252_v11, %v1180_v8 }
 0x1b0   : > { %1526 = vst [vmem:[%s3088_s11 + $0x50] sm:$0xff] %v1510_v62  ;;  %v1541_v58 = vadd.f32 %v1540_v47, %v1510_v62  ;;  %v1563_v46 = vmul.f32 %v1510_v62, %v1510_v62 }
 0x1b1   : > { %v1157_v44 = vpop.f32.mrf.mxu1  ;;  %v1360_v17 = vpop.f32.mrf.mxu3 }
 0x1b2   : > { %v1578_v51 = vadd.f32 %v1577_v12, %v1563_v46  ;;  %v1386_v26 = vadd.f32 %v1360_v17, %v1278_v32  ;;  %v1181_v25 = vadd.f32 %v1157_v44, %v3054_v61 }
 0x1b3   : > { %v1465_v38 = vpop.f32.mrf.mxu0 }
 0x1b4   : > { %v1491_v19 = vadd.f32 %v1465_v38, %v1386_v26 }
 0x1b6   : > { %v1511_v16 = vadd.f32 %v3081_v10, %v1491_v19  ;;  %v1255_v20 = vpop.f32.mrf.mxu2 }
 0x1b7   : > { %v1279_v7 = vadd.f32 %v1255_v20, %v1181_v25 }
 0x1b8   : > { %1527 = vst [vmem:[%s3088_s11 + $0x58] sm:$0xff] %v1511_v16  ;;  %v1542_v43 = vadd.f32 %v1541_v58, %v1511_v16  ;;  %v1564_v5 = vmul.f32 %v1511_v16, %v1511_v16 }
 0x1b9   : > { %v1160_v24 = vpop.f32.mrf.mxu1  ;;  %v1363_v42 = vpop.f32.mrf.mxu3 }
 0x1ba   : > { %v1579_v59 = vadd.f32 %v1578_v51, %v1564_v5  ;;  %v1387_v9 = vadd.f32 %v1363_v42, %v1279_v7  ;;  %v1182_v23 = vadd.f32 %v1160_v24, %v3062_v60 }
 0x1bb   : > { %v1468_v33 = vpop.f32.mrf.mxu0 }
 0x1bc   : > { %v1492_v37 = vadd.f32 %v1468_v33, %v1387_v9 }
 0x1be   : > { %v1512_v63 = vadd.f32 %v3081_v10, %v1492_v37  ;;  %v1258_v61 = vpop.f32.mrf.mxu2 }
 0x1bf   : > { %v1280_v6 = vadd.f32 %v1258_v61, %v1182_v23 }
 0x1c0   : > { %1528 = vst [vmem:[%s3088_s11 + $0x60] sm:$0xff] %v1512_v63  ;;  %v1543_v13 = vadd.f32 %v1542_v43, %v1512_v63  ;;  %v1565_v55 = vmul.f32 %v1512_v63, %v1512_v63 }
 0x1c1   : > { %v1163_v40 = vpop.f32.mrf.mxu1  ;;  %v1366_v3 = vpop.f32.mrf.mxu3 }
 0x1c2   : > { %v1580_v57 = vadd.f32 %v1579_v59, %v1565_v55  ;;  %v1388_v52 = vadd.f32 %v1366_v3, %v1280_v6  ;;  %v1183_v14 = vadd.f32 %v1163_v40, %v3067_v45 }
 0x1c3   : > { %v1471_v21 = vpop.f32.mrf.mxu0 }
 0x1c4   : > { %v1493_v39 = vadd.f32 %v1471_v21, %v1388_v52 }
 0x1c6   : > { %v1513_v27 = vadd.f32 %v3081_v10, %v1493_v39  ;;  %v1261_v60 = vpop.f32.mrf.mxu2 }
 0x1c7   : > { %v1281_v50 = vadd.f32 %v1261_v60, %v1183_v14 }
 0x1c8   : > { %1529 = vst [vmem:[%s3088_s11 + $0x68] sm:$0xff] %v1513_v27  ;;  %v1544_v35 = vadd.f32 %v1543_v13, %v1513_v27  ;;  %v1566_v2 = vmul.f32 %v1513_v27, %v1513_v27 }
 0x1c9   : > { %v1369_v30 = vpop.f32.mrf.mxu3  ;;  %v1166_v31 = vpop.f32.mrf.mxu1 }
 0x1ca   : > { %v1581_v36 = vadd.f32 %v1580_v57, %v1566_v2  ;;  %v1389_v34 = vadd.f32 %v1369_v30, %v1281_v50  ;;  %v1184_v28 = vadd.f32 %v1166_v31, %v3075_v22 }
 0x1cb   : > { %v1474_v48 = vpop.f32.mrf.mxu0 }
 0x1cc   : > { %v1494_v54 = vadd.f32 %v1474_v48, %v1389_v34 }
 0x1ce   : > { %v1514_v45 = vadd.f32 %v3081_v10, %v1494_v54  ;;  %v1264_v49 = vpop.f32.mrf.mxu2 }
 0x1cf   : > { %v1282_v56 = vadd.f32 %v1264_v49, %v1184_v28 }
 0x1d0   : > { %1530 = vst [vmem:[%s3088_s11 + $0x70] sm:$0xff] %v1514_v45  ;;  %v1545_v1 = vadd.f32 %v1544_v35, %v1514_v45  ;;  %v1567_v41 = vmul.f32 %v1514_v45, %v1514_v45 }
 0x1d1   : > { %v1372_v47 = vpop.f32.mrf.mxu3 }
 0x1d2   : > { %v1582_v18 = vadd.f32 %v1581_v36, %v1567_v41  ;;  %v1390_v0 = vadd.f32 %v1372_v47, %v1282_v56 }
 0x1d3   : > { %v1477_v15 = vpop.f32.mrf.mxu0 }
 0x1d4   : > { %v1495_v12 = vadd.f32 %v1477_v15, %v1390_v0 }
 0x1d6   : > { %v1515_v4 = vadd.f32 %v3081_v10, %v1495_v12 }
 0x1d8   : > { %1531 = vst [vmem:[%s3088_s11 + $0x78] sm:$0xff] %v1515_v4  ;;  %v1546_v29 = vadd.f32 %v1545_v1, %v1515_v4  ;;  %v1568_v22 = vmul.f32 %v1515_v4, %v1515_v4 }
 0x1da   : > { %v1547_v53 = vrot.slane %v1546_v29, 4  ;;  %v1583_v8 = vadd.f32 %v1582_v18, %v1568_v22 }
 0x1dc   : > { %v1548_v62 = vadd.f32 %v1547_v53, %v1546_v29  ;;  %v1584_v11 = vrot.slane %v1583_v8, 4 }
 0x1de   : > { %v1549_v32 = vrot.slane %v1548_v62, 2  ;;  %v1585_v58 = vadd.f32 %v1584_v11, %v1583_v8 }
 0x1e0   : > { %v1550_v46 = vadd.f32 %v1549_v32, %v1548_v62  ;;  %v1586_v44 = vrot.slane %v1585_v58, 2 }
 0x1e2   : > { %v1551_v17 = vrot.slane %v1550_v46, 1  ;;  %v1587_v51 = vadd.f32 %v1586_v44, %v1585_v58 }
 0x1e4   : > { %v1588_v26 = vrot.slane %v1587_v51, 1  ;;  %v1552_v10 = vadd.f32 %v1551_v17, %v1550_v46 }
 0x1e6   : > { %v1589_v38 = vadd.f32 %v1588_v26, %v1587_v51 }
 0x1e8   : > { %v1591_v19 = vsel %vm1590_vm2, %v1552_v10, %v1589_v38 }
 0x1e9   : > { %1592 = vst [vmem:[%s444_s16] sm:$0x3] %v1591_v19 }
 0x1ea PF: > { %s17_s25 = sadd.s32 1, %s2080_s25   ;;  %s3170_s21 = smov %s2072_s23 }
 0x1eb   : > { %p14_p11 = scmp.ge.s32.totalorder %s17_s25, 6   ;;  %s3171_s22 = smov %s2076_s24 }
 0x1ec   : > { %s3172_s23 = smov %s3175_s26  ;;  %s3173_s24 = smov %s3179_s27 }
 0x1ed   :  { %16 = sbr.rel (!%p14_p11) target bundleno = 3 (0x3), region = 96 }

</bundles_post_ra>
